<compile_context>
chip_gen: v7x
topology: tpu7x:2x2x1
jax: 0.10.0
libtpu: 0.0.40
codegen_flags: <defaults>
</compile_context>

<pallas_src>
import jax
import jax.numpy as jnp
from jax import lax
from jax.experimental import pallas as pl
from jax.experimental.pallas import tpu as pltpu

NUM_LAYERS = 2
IN_H, IN_W = 42, 54          # -> 16x22x28 -> 32x12x15 -> 5760 features
FLAT_FEATURES = 5760
NUM_CLASSES = 6


# -----------------------------------------------------------------------------
# XLA-side im2col, pool-offset major, lane-dense:  (N, 9*Cin, 4*Mp')
# -----------------------------------------------------------------------------
def build_pool_patches(x_nchw, dtype=jnp.bfloat16):
    """patches[n, k*Cin+c, po*Mp' + h2*W2 + w2] = x_pad[n, c, 2h2+ph+dh, 2w2+pw+dw]

    k = dh*3+dw (tap), po = ph*2+pw (pool offset).  Pooled rows sit on lanes
    (Mp' a multiple of 128, so the 4 pool slabs stay vreg-aligned); taps and
    channels sit on sublanes.  Output dtype is bf16 to halve the DMA bytes.
    """
    x = x_nchw.astype(dtype)
    n, cin, h, w = x.shape
    ho, wo = h + 2, w + 2            # conv out: H + 2*pad - (k - 1)
    h2, w2 = ho // 2, wo // 2        # after 2x2 max-pool
    m = h2 * w2
    mp = ((m + 127) // 128) * 128    # lane-align pooled positions
    xp = jnp.pad(x, ((0, 0), (0, 0), (2, 2), (2, 2)))
    taps = jnp.stack(
        [xp[:, :, dh:dh + ho, dw:dw + wo] for dh in range(3) for dw in range(3)],
        axis=1)                                        # (n, 9, cin, ho, wo)
    t = taps.reshape(n, 9, cin, h2, 2, w2, 2)
    t = t.transpose(0, 1, 2, 4, 6, 3, 5)               # (n, 9, cin, ph, pw, h2, w2)
    t = t.reshape(n, 9 * cin, 4, m)
    if mp != m:
        t = jnp.pad(t, ((0, 0), (0, 0), (0, 0), (0, mp - m)))
    return t.reshape(n, 9 * cin, 4 * mp), (h2, w2, m, mp)


# -----------------------------------------------------------------------------
# Kernel 1: Conv2d(3x3, s=1, p=2) + bias + ReLU + MaxPool2d(2), fused
# -----------------------------------------------------------------------------
def conv_relu_pool_kernel(p_ref, w_ref, b_ref, o_ref):
    # p_ref: (1, K, 4*Mp') bf16   pool-offset-major im2col patches (K = 9*Cin)
    # w_ref: (Cout, K)     bf16   tap-major conv weight
    # b_ref: (Cout, 1)     f32
    # o_ref: (1, Cout, Mp') bf16  pooled activations, spatial on lanes
    mp = o_ref.shape[2]
    # Single MXU matmul for all taps / all pool offsets of this image.
    y = jnp.dot(w_ref[...], p_ref[0], preferred_element_type=jnp.float32)
    # Fused 2x2 max-pool: 4 pool offsets = 4 vreg-aligned lane slabs.
    pooled = jnp.maximum(
        jnp.maximum(y[:, 0 * mp:1 * mp], y[:, 1 * mp:2 * mp]),
        jnp.maximum(y[:, 2 * mp:3 * mp], y[:, 3 * mp:4 * mp]),
    )
    # Bias + ReLU commute with the max-pool (per-channel constant), apply post-pool.
    o_ref[0] = jnp.maximum(pooled + b_ref[...], 0.0).astype(o_ref.dtype)


def conv_relu_pool(x_nchw, w_k, b):
    """One CNN layer. Returns the pooled activation as NCHW (bf16)."""
    n = x_nchw.shape[0]
    cout = w_k.shape[0]
    patches, (h2, w2, m, mp) = build_pool_patches(x_nchw)
    k = patches.shape[1]
    out = pl.pallas_call(
        conv_relu_pool_kernel,
        out_shape=jax.ShapeDtypeStruct((n, cout, mp), jnp.bfloat16),
        grid=(n,),
        in_specs=[
            pl.BlockSpec((1, k, 4 * mp), lambda i: (i, 0, 0)),
            pl.BlockSpec((cout, k), lambda i: (0, 0)),
            pl.BlockSpec((cout, 1), lambda i: (0, 0)),
        ],
        out_specs=pl.BlockSpec((1, cout, mp), lambda i: (i, 0, 0)),
        compiler_params=pltpu.CompilerParams(
            dimension_semantics=("parallel",),   # both v7x TensorCores take images
        ),
    )(patches, w_k, b)
    # Drop the lane-padding junk columns and restore NCHW for the next layer.
    return out[:, :, :m].reshape(n, cout, h2, w2)


# -----------------------------------------------------------------------------
# Kernel 2: last conv layer + ReLU + pool  FUSED with  Linear(5760,6) + Softmax
# -----------------------------------------------------------------------------
def conv_relu_pool_head_kernel(p_ref, w_ref, b_ref, wl_ref, bl_ref, o_ref):
    # p_ref:  (1, K, 4*Mp') bf16   im2col patches (K = 9*Cin = 144)
    # w_ref:  (Cout, K)     bf16   conv weight (Cout = 32)
    # b_ref:  (Cout, 1)     f32    conv bias
    # wl_ref: (6, Cout, Mp') f32   linear weight, junk spatial columns zeroed
    # bl_ref: (6, 1)        f32    linear bias
    # o_ref:  (1, 6, 1)     f32    class probabilities
    mp = wl_ref.shape[2]
    y = jnp.dot(w_ref[...], p_ref[0], preferred_element_type=jnp.float32)
    pooled = jnp.maximum(
        jnp.maximum(y[:, 0 * mp:1 * mp], y[:, 1 * mp:2 * mp]),
        jnp.maximum(y[:, 2 * mp:3 * mp], y[:, 3 * mp:4 * mp]),
    )
    feats = jnp.maximum(pooled + b_ref[...], 0.0)          # (Cout, Mp') f32, in VMEM
    # Linear head: feats in (channel, spatial) order == PyTorch NCHW-flatten order.
    # logits[cls] = sum_{c,m} feats[c,m] * wl[cls,c,m]   (pad columns of wl are 0,
    # so the junk pooled columns contribute nothing).  Tiny VPU contraction.
    prod = wl_ref[...] * feats[None, :, :]                 # (6, Cout, Mp')
    t = jnp.sum(prod, axis=2)                              # (6, Cout)   lane reduce
    logits = jnp.sum(t, axis=1, keepdims=True) + bl_ref[...]   # (6, 1)
    # Softmax over the 6 classes.
    mx = jnp.max(logits)
    e = jnp.exp(logits - mx)
    o_ref[0] = (e / jnp.sum(e)).astype(o_ref.dtype)


def conv_relu_pool_head(x_nchw, w_k, b, wl3, bl):
    n = x_nchw.shape[0]
    cout = w_k.shape[0]
    patches, (h2, w2, m, mp) = build_pool_patches(x_nchw)
    k = patches.shape[1]
    ncls = wl3.shape[0]
    probs = pl.pallas_call(
        conv_relu_pool_head_kernel,
        out_shape=jax.ShapeDtypeStruct((n, ncls, 1), jnp.float32),
        grid=(n,),
        in_specs=[
            pl.BlockSpec((1, k, 4 * mp), lambda i: (i, 0, 0)),
            pl.BlockSpec((cout, k), lambda i: (0, 0)),
            pl.BlockSpec((cout, 1), lambda i: (0, 0)),
            pl.BlockSpec((ncls, cout, mp), lambda i: (0, 0, 0)),
            pl.BlockSpec((ncls, 1), lambda i: (0, 0)),
        ],
        out_specs=pl.BlockSpec((1, ncls, 1), lambda i: (i, 0, 0)),
        compiler_params=pltpu.CompilerParams(
            dimension_semantics=("parallel",),
        ),
    )(patches, w_k, b, wl3, bl)
    return probs.reshape(n, ncls)


# -----------------------------------------------------------------------------
# Parameters (canonical / PyTorch-equivalent) + one-time kernel re-layout
# -----------------------------------------------------------------------------
def init_params(key):
    conv_params = []
    cin, cout = 1, 16
    for _ in range(NUM_LAYERS):
        key, k1, k2 = jax.random.split(key, 3)
        fan_in = cin * 9
        w = jax.random.normal(k1, (3, 3, cin, cout), jnp.float32) / jnp.sqrt(
            jnp.float32(fan_in))                               # HWIO conv weight
        b = 0.01 * jax.random.normal(k2, (1, cout), jnp.float32)
        conv_params.append((w, b))
        cin, cout = cout, cout * 2
    key, k1, k2 = jax.random.split(key, 3)
    # Canonical linear weight: rows in NCHW-flatten order (== nn.Flatten on NCHW).
    wl = jax.random.normal(k1, (FLAT_FEATURES, NUM_CLASSES), jnp.float32) / jnp.sqrt(
        jnp.float32(FLAT_FEATURES))
    bl = 0.01 * jax.random.normal(k2, (1, NUM_CLASSES), jnp.float32)
    return conv_params, (wl, bl)


def prepare_kernel_params(conv_params, lin_params):
    """Init-time weight re-layout for the Pallas pipeline (free, one-off)."""
    kconv = []
    h, w = IN_H, IN_W
    for w_hwio, b in conv_params:
        cin, cout = w_hwio.shape[2], w_hwio.shape[3]
        # (Cout, 9*Cin) tap-major, bf16 operands (f32 accumulate in-kernel).
        kconv.append((w_hwio.reshape(9 * cin, cout).T.astype(jnp.bfloat16),
                      b.reshape(cout, 1).astype(jnp.float32)))
        h, w = (h + 2) // 2, (w + 2) // 2
    cout = conv_params[-1][0].shape[3]
    m = h * w
    mp = ((m + 127) // 128) * 128
    wl, bl = lin_params
    assert wl.shape[0] == cout * m == FLAT_FEATURES
    # Kernel features are (Cout, spatial) == NCHW-flatten order already; only
    # zero-pad the spatial dim to Mp' (junk pooled columns x 0) and transpose
    # so the big dims are (sublane=Cout, lane=Mp') — lane-dense.
    wl3 = wl.reshape(cout, m, NUM_CLASSES)
    wl3 = jnp.pad(wl3, ((0, 0), (0, mp - m), (0, 0)))
    wl3 = jnp.transpose(wl3, (2, 0, 1)).astype(jnp.float32)     # (6, Cout, Mp')
    return kconv, (wl3, bl.reshape(NUM_CLASSES, 1).astype(jnp.float32))


# -----------------------------------------------------------------------------
# Forward passes
# -----------------------------------------------------------------------------
@jax.jit
def cnn_forward(x_nchw, kconv_params, klin_params):
    x = x_nchw
    for w_k, b in kconv_params[:-1]:
        x = conv_relu_pool(x, w_k, b)
    w_k, b = kconv_params[-1]
    wl3, bl = klin_params
    return conv_relu_pool_head(x, w_k, b, wl3, bl)


def reference_forward(x_nchw, conv_params, lin_params):
    """Pure-JAX reference with exact PyTorch semantics (NCHW, f32 HIGHEST)."""
    x = x_nchw
    for w_hwio, b in conv_params:
        cout = w_hwio.shape[3]
        y = lax.conv_general_dilated(
            x, w_hwio, window_strides=(1, 1), padding=((2, 2), (2, 2)),
            dimension_numbers=("NCHW", "HWIO", "NCHW"),
            precision=lax.Precision.HIGHEST)
        y = jnp.maximum(y + b.reshape(1, cout, 1, 1), 0.0)
        x = lax.reduce_window(y, -jnp.inf, lax.max, (1, 1, 2, 2), (1, 1, 2, 2), "VALID")
    feats = x.reshape(x.shape[0], -1)          # nn.Flatten() on NCHW
    wl, bl = lin_params
    logits = jnp.dot(feats, wl, precision=lax.Precision.HIGHEST) + bl
    return jax.nn.softmax(logits, axis=1)


if __name__ == "__main__":
    key = jax.random.PRNGKey(0)
    key, pkey, xkey = jax.random.split(key, 3)
    conv_params, lin_params = init_params(pkey)
    kconv_params, klin_params = prepare_kernel_params(conv_params, lin_params)

    # (N=2, C=1, H=42, W=54): two rounds of (conv k=3 s=1 p=2 -> maxpool 2)
    # give (12, 15) spatial with 32 channels -> 5760 features, matching
    # nn.Linear(5760, 6) in the module.
    x = jax.random.normal(xkey, (2, 1, IN_H, IN_W), jnp.float32)

    probs = cnn_forward(x, kconv_params, klin_params)
    probs = jax.block_until_ready(probs)

    ref = reference_forward(x, conv_params, lin_params)
    assert probs.shape == (2, NUM_CLASSES)
    assert jnp.allclose(jnp.sum(probs, axis=1), 1.0, atol=1e-5)
    # Kernel path intentionally uses bf16 operands (patches / activations /
    # conv weights) with f32 accumulation; reference is full-f32 HIGHEST.
    assert jnp.allclose(probs, ref, atol=2e-2, rtol=2e-2)

    print("KERNEL_OK")
</pallas_src>

<mosaic_0001>
module attributes {stable_mosaic.version = 11 : i64} {
  func.func @conv_relu_pool_kernel(%arg0: i32, %arg1: memref<1x9x2560xbf16, #tpu.memory_space<vmem>>, %arg2: memref<16x9xbf16, #tpu.memory_space<vmem>>, %arg3: memref<16x1xf32, #tpu.memory_space<vmem>>, %arg4: memref<1x16x640xbf16, #tpu.memory_space<vmem>>) attributes {dimension_semantics = [#tpu.dimension_semantics<parallel>], iteration_bounds = array<i64: 2>, scalar_prefetch = 0 : i64, scratch_operands = 0 : i64, tpu.core_type = #tpu.core_type<tc>, window_params = [{transform_indices = @transform_0, window_bounds = array<i64: 1, 9, 2560>}, {pipeline_mode = #tpu.pipeline_mode<synchronous>, transform_indices = @transform_1, window_bounds = array<i64: 16, 9>}, {pipeline_mode = #tpu.pipeline_mode<synchronous>, transform_indices = @transform_2, window_bounds = array<i64: 16, 1>}, {transform_indices = @transform_3, window_bounds = array<i64: 1, 16, 640>}]} {
    %c0 = arith.constant 0 : index
    %c0_0 = arith.constant 0 : index
    %0 = vector.load %arg2[%c0, %c0_0] : memref<16x9xbf16, #tpu.memory_space<vmem>>, vector<16x9xbf16>
    %c0_1 = arith.constant 0 : index
    %c0_2 = arith.constant 0 : index
    %c0_3 = arith.constant 0 : index
    %1 = vector.load %arg1[%c0_1, %c0_2, %c0_3] : memref<1x9x2560xbf16, #tpu.memory_space<vmem>>, vector<1x9x2560xbf16>
    %2 = vector.shape_cast %1 : vector<1x9x2560xbf16> to vector<9x2560xbf16>
    %cst = arith.constant dense<0.000000e+00> : vector<16x2560xf32>
    %3 = tpu.matmul %0, %2, %cst {dimension_numbers = #tpu.dot_dimension_numbers<[1], [0], [0], [1], [0, 0, 1, 1], [], []>} : vector<16x9xbf16>, vector<9x2560xbf16>, vector<16x2560xf32> -> vector<16x2560xf32>
    %4 = vector.extract_strided_slice %3 {offsets = [0, 0], sizes = [16, 640], strides = [1, 1]} : vector<16x2560xf32> to vector<16x640xf32>
    %5 = vector.extract_strided_slice %3 {offsets = [0, 640], sizes = [16, 640], strides = [1, 1]} : vector<16x2560xf32> to vector<16x640xf32>
    %6 = arith.maximumf %4, %5 : vector<16x640xf32>
    %7 = vector.extract_strided_slice %3 {offsets = [0, 1280], sizes = [16, 640], strides = [1, 1]} : vector<16x2560xf32> to vector<16x640xf32>
    %8 = vector.extract_strided_slice %3 {offsets = [0, 1920], sizes = [16, 640], strides = [1, 1]} : vector<16x2560xf32> to vector<16x640xf32>
    %9 = arith.maximumf %7, %8 : vector<16x640xf32>
    %10 = arith.maximumf %6, %9 : vector<16x640xf32>
    %c0_4 = arith.constant 0 : index
    %c0_5 = arith.constant 0 : index
    %11 = vector.load %arg3[%c0_4, %c0_5] : memref<16x1xf32, #tpu.memory_space<vmem>>, vector<16x1xf32>
    %12 = vector.broadcast %11 : vector<16x1xf32> to vector<16x640xf32>
    %13 = arith.addf %10, %12 : vector<16x640xf32>
    %cst_6 = arith.constant 0.000000e+00 : f32
    %14 = vector.broadcast %cst_6 : f32 to vector<16x640xf32>
    %15 = arith.maximumf %13, %14 : vector<16x640xf32>
    %16 = arith.truncf %15 : vector<16x640xf32> to vector<16x640xbf16>
    %c0_7 = arith.constant 0 : index
    %c0_8 = arith.constant 0 : index
    %c0_9 = arith.constant 0 : index
    %17 = vector.load %arg4[%c0_7, %c0_8, %c0_9] : memref<1x16x640xbf16, #tpu.memory_space<vmem>>, vector<1x16x640xbf16>
    %18 = vector.shape_cast %17 : vector<1x16x640xbf16> to vector<16x640xbf16>
    %19 = vector.shape_cast %16 : vector<16x640xbf16> to vector<1x16x640xbf16>
    tpu.vector_store %arg4[%c0_7, %c0_8, %c0_9], %19 {strides = array<i32>} : memref<1x16x640xbf16, #tpu.memory_space<vmem>>, vector<1x16x640xbf16>,
    return
  }
  func.func @transform_0(%arg0: i32) -> (i32, i32, i32) {
    %c0_i32 = arith.constant 0 : i32
    %c0_i32_0 = arith.constant 0 : i32
    %c0_i32_1 = arith.constant 0 : i32
    return %arg0, %c0_i32, %c0_i32_0 : i32, i32, i32
  }
  func.func @transform_1(%arg0: i32) -> (i32, i32) {
    %c0_i32 = arith.constant 0 : i32
    %c0_i32_0 = arith.constant 0 : i32
    %c0_i32_1 = arith.constant 0 : i32
    return %c0_i32, %c0_i32_0 : i32, i32
  }
  func.func @transform_2(%arg0: i32) -> (i32, i32) {
    %c0_i32 = arith.constant 0 : i32
    %c0_i32_0 = arith.constant 0 : i32
    %c0_i32_1 = arith.constant 0 : i32
    return %c0_i32, %c0_i32_0 : i32, i32
  }
  func.func @transform_3(%arg0: i32) -> (i32, i32, i32) {
    %c0_i32 = arith.constant 0 : i32
    %c0_i32_0 = arith.constant 0 : i32
    %c0_i32_1 = arith.constant 0 : i32
    return %arg0, %c0_i32, %c0_i32_0 : i32, i32, i32
  }
}

module attributes {stable_mosaic.version = 11 : i64} {
  func.func @conv_relu_pool_head_kernel(%arg0: i32, %arg1: memref<1x144x1024xbf16, #tpu.memory_space<vmem>>, %arg2: memref<32x144xbf16, #tpu.memory_space<vmem>>, %arg3: memref<32x1xf32, #tpu.memory_space<vmem>>, %arg4: memref<6x32x256xf32, #tpu.memory_space<vmem>>, %arg5: memref<6x1xf32, #tpu.memory_space<vmem>>, %arg6: memref<1x6x1xf32, #tpu.memory_space<vmem>>) attributes {dimension_semantics = [#tpu.dimension_semantics<parallel>], iteration_bounds = array<i64: 2>, scalar_prefetch = 0 : i64, scratch_operands = 0 : i64, tpu.core_type = #tpu.core_type<tc>, window_params = [{transform_indices = @transform_0, window_bounds = array<i64: 1, 144, 1024>}, {pipeline_mode = #tpu.pipeline_mode<synchronous>, transform_indices = @transform_1, window_bounds = array<i64: 32, 144>}, {pipeline_mode = #tpu.pipeline_mode<synchronous>, transform_indices = @transform_2, window_bounds = array<i64: 32, 1>}, {pipeline_mode = #tpu.pipeline_mode<synchronous>, transform_indices = @transform_3, window_bounds = array<i64: 6, 32, 256>}, {pipeline_mode = #tpu.pipeline_mode<synchronous>, transform_indices = @transform_4, window_bounds = array<i64: 6, 1>}, {transform_indices = @transform_5, window_bounds = array<i64: 1, 6, 1>}]} {
    %c0 = arith.constant 0 : index
    %c0_0 = arith.constant 0 : index
    %0 = vector.load %arg2[%c0, %c0_0] : memref<32x144xbf16, #tpu.memory_space<vmem>>, vector<32x144xbf16>
    %c0_1 = arith.constant 0 : index
    %c0_2 = arith.constant 0 : index
    %c0_3 = arith.constant 0 : index
    %1 = vector.load %arg1[%c0_1, %c0_2, %c0_3] : memref<1x144x1024xbf16, #tpu.memory_space<vmem>>, vector<1x144x1024xbf16>
    %2 = vector.shape_cast %1 : vector<1x144x1024xbf16> to vector<144x1024xbf16>
    %cst = arith.constant dense<0.000000e+00> : vector<32x1024xf32>
    %3 = tpu.matmul %0, %2, %cst {dimension_numbers = #tpu.dot_dimension_numbers<[1], [0], [0], [1], [0, 0, 1, 1], [], []>} : vector<32x144xbf16>, vector<144x1024xbf16>, vector<32x1024xf32> -> vector<32x1024xf32>
    %4 = vector.extract_strided_slice %3 {offsets = [0, 0], sizes = [32, 256], strides = [1, 1]} : vector<32x1024xf32> to vector<32x256xf32>
    %5 = vector.extract_strided_slice %3 {offsets = [0, 256], sizes = [32, 256], strides = [1, 1]} : vector<32x1024xf32> to vector<32x256xf32>
    %6 = arith.maximumf %4, %5 : vector<32x256xf32>
    %7 = vector.extract_strided_slice %3 {offsets = [0, 512], sizes = [32, 256], strides = [1, 1]} : vector<32x1024xf32> to vector<32x256xf32>
    %8 = vector.extract_strided_slice %3 {offsets = [0, 768], sizes = [32, 256], strides = [1, 1]} : vector<32x1024xf32> to vector<32x256xf32>
    %9 = arith.maximumf %7, %8 : vector<32x256xf32>
    %10 = arith.maximumf %6, %9 : vector<32x256xf32>
    %c0_4 = arith.constant 0 : index
    %c0_5 = arith.constant 0 : index
    %11 = vector.load %arg3[%c0_4, %c0_5] : memref<32x1xf32, #tpu.memory_space<vmem>>, vector<32x1xf32>
    %12 = vector.broadcast %11 : vector<32x1xf32> to vector<32x256xf32>
    %13 = arith.addf %10, %12 : vector<32x256xf32>
    %cst_6 = arith.constant 0.000000e+00 : f32
    %14 = vector.broadcast %cst_6 : f32 to vector<32x256xf32>
    %15 = arith.maximumf %13, %14 : vector<32x256xf32>
    %c0_7 = arith.constant 0 : index
    %c0_8 = arith.constant 0 : index
    %c0_9 = arith.constant 0 : index
    %16 = vector.load %arg4[%c0_7, %c0_8, %c0_9] : memref<6x32x256xf32, #tpu.memory_space<vmem>>, vector<6x32x256xf32>
    %17 = vector.shape_cast %15 : vector<32x256xf32> to vector<1x32x256xf32>
    %18 = vector.broadcast %17 : vector<1x32x256xf32> to vector<6x32x256xf32>
    %19 = arith.mulf %16, %18 : vector<6x32x256xf32>
    %cst_10 = arith.constant dense<0.000000e+00> : vector<6x32xf32>
    %20 = vector.multi_reduction <add>, %19, %cst_10 [2] : vector<6x32x256xf32> to vector<6x32xf32>
    %cst_11 = arith.constant dense<0.000000e+00> : vector<6xf32>
    %21 = vector.multi_reduction <add>, %20, %cst_11 [1] : vector<6x32xf32> to vector<6xf32>
    %22 = vector.shape_cast %21 : vector<6xf32> to vector<6x1xf32>
    %c0_12 = arith.constant 0 : index
    %c0_13 = arith.constant 0 : index
    %23 = vector.load %arg5[%c0_12, %c0_13] : memref<6x1xf32, #tpu.memory_space<vmem>>, vector<6x1xf32>
    %24 = arith.addf %22, %23 : vector<6x1xf32>
    %25 = vector.shape_cast %24 : vector<6x1xf32> to vector<1x6x1xf32>
    %cst_14 = arith.constant dense<0xFF800000> : vector<1xf32>
    %26 = vector.multi_reduction <maximumf>, %25, %cst_14 [1, 2] : vector<1x6x1xf32> to vector<1xf32>
    %27 = vector.shape_cast %26 : vector<1xf32> to vector<1x1x1xf32>
    %28 = vector.extract %27[0, 0, 0] : f32 from vector<1x1x1xf32>
    %29 = vector.broadcast %28 : f32 to vector<6x1xf32>
    %30 = arith.subf %24, %29 : vector<6x1xf32>
    %31 = math.exp %30 : vector<6x1xf32>
    %32 = vector.shape_cast %31 : vector<6x1xf32> to vector<1x6x1xf32>
    %cst_15 = arith.constant dense<0.000000e+00> : vector<1xf32>
    %33 = vector.multi_reduction <add>, %32, %cst_15 [1, 2] : vector<1x6x1xf32> to vector<1xf32>
    %34 = vector.shape_cast %33 : vector<1xf32> to vector<1x1x1xf32>
    %35 = vector.extract %34[0, 0, 0] : f32 from vector<1x1x1xf32>
    %36 = vector.broadcast %35 : f32 to vector<6x1xf32>
    %37 = arith.divf %31, %36 : vector<6x1xf32>
    %c0_16 = arith.constant 0 : index
    %c0_17 = arith.constant 0 : index
    %c0_18 = arith.constant 0 : index
    %38 = vector.load %arg6[%c0_16, %c0_17, %c0_18] : memref<1x6x1xf32, #tpu.memory_space<vmem>>, vector<1x6x1xf32>
    %39 = vector.shape_cast %38 : vector<1x6x1xf32> to vector<6x1xf32>
    %40 = vector.shape_cast %37 : vector<6x1xf32> to vector<1x6x1xf32>
    tpu.vector_store %arg6[%c0_16, %c0_17, %c0_18], %40 {strides = array<i32>} : memref<1x6x1xf32, #tpu.memory_space<vmem>>, vector<1x6x1xf32>,
    return
  }
  func.func @transform_0(%arg0: i32) -> (i32, i32, i32) {
    %c0_i32 = arith.constant 0 : i32
    %c0_i32_0 = arith.constant 0 : i32
    %c0_i32_1 = arith.constant 0 : i32
    return %arg0, %c0_i32, %c0_i32_0 : i32, i32, i32
  }
  func.func @transform_1(%arg0: i32) -> (i32, i32) {
    %c0_i32 = arith.constant 0 : i32
    %c0_i32_0 = arith.constant 0 : i32
    %c0_i32_1 = arith.constant 0 : i32
    return %c0_i32, %c0_i32_0 : i32, i32
  }
  func.func @transform_2(%arg0: i32) -> (i32, i32) {
    %c0_i32 = arith.constant 0 : i32
    %c0_i32_0 = arith.constant 0 : i32
    %c0_i32_1 = arith.constant 0 : i32
    return %c0_i32, %c0_i32_0 : i32, i32
  }
  func.func @transform_3(%arg0: i32) -> (i32, i32, i32) {
    %c0_i32 = arith.constant 0 : i32
    %c0_i32_0 = arith.constant 0 : i32
    %c0_i32_1 = arith.constant 0 : i32
    %c0_i32_2 = arith.constant 0 : i32
    return %c0_i32, %c0_i32_0, %c0_i32_1 : i32, i32, i32
  }
  func.func @transform_4(%arg0: i32) -> (i32, i32) {
    %c0_i32 = arith.constant 0 : i32
    %c0_i32_0 = arith.constant 0 : i32
    %c0_i32_1 = arith.constant 0 : i32
    return %c0_i32, %c0_i32_0 : i32, i32
  }
  func.func @transform_5(%arg0: i32) -> (i32, i32, i32) {
    %c0_i32 = arith.constant 0 : i32
    %c0_i32_0 = arith.constant 0 : i32
    %c0_i32_1 = arith.constant 0 : i32
    return %arg0, %c0_i32, %c0_i32_0 : i32, i32, i32
  }
}

</mosaic_0001>

<bundles_post_ra>
// kernel: cnn_forward.2
= control target key start
LH: loop header
LB: loop body
LE: loop exit
PB: predicated region body
PF: predicated region fallthrough
CT: control target
= control target key end

     0   :  { %s1058_s12 = smov 0   ;;  %s1180_s0 = inlined_call_operand.vmem [shape: bf16[2,9,2560], index: 0, kind: input, shape index: {}]   ;;  %s1181_s1 = inlined_call_operand.vmem [shape: bf16[16,9], index: 1, kind: input, shape index: {}]   ;;  %s1182_s2 = inlined_call_operand.vmem [shape: f32[16,1], index: 2, kind: input, shape index: {}]   ;;  %s1183_s3 = inlined_call_operand.vmem [shape: bf16[2,16,640], index: 3, kind: output, shape index: {}]  }
   0x1 LB: > { %s932_s13 = sadd.s32 4294967295, %s1034_s12   ;;  %p936_p0 = scmp.ge.s32.totalorder %s1034_s12, 1  ;;  %s1034_s12 = sphi %s1058_s12, %s13_s12  }
   0x2   : > { %p137_p1 = scmp.lt.s32.totalorder %s1034_s12, 3 }
   0x4   : > { %p138_p2 = pnand %p936_p0, %p137_p1 }
   0x5   : > { %p161_p3 = scmp.lt.s32.totalorder (!%p138_p2), %s932_s13, 1  ;;  %vm283_vm0 = vcmask (!%p138_p2), 1043456   ;;  %v1036_v0 = vmov (!%p138_p2), 0   ;;  %v807_v1 = vld [vmem:[%s1182_s2] sm:$0xff] (!%p138_p2)  ;;  %vm284_vm1 = vcmask (!%p138_p2), 1044480   ;;  %v1037_v2 = vmov (!%p138_p2), 65535  }
   0x6   : > { %141 = sbr.rel (%p138_p2) target bundleno = 282 (0x11a), region = 32  ;;  %379 = vmatprep.mubr.bf16.mxu0 (!%p138_p2), %v1036_v0  ;;  %422 = vmatprep.mubr.bf16.mxu1 (!%p138_p2), %v1036_v0  ;;  %v285_v3 = vsel (!%p138_p2), %vm283_vm0, 4294967295, %v1037_v2  ;;  %v808_v4 = vld [vmem:[%s1182_s2 + $0x8] sm:$0xff] (!%p138_p2)  ;;  %v1094_v12 = vld [vmem:[%s1181_s1] sm:$0xff] (!%p138_p2)   ;;  %vm279_vm2 = vcmask (!%p138_p2), 72704  }
   0x7   : > { %996 = vset.pattern.permute.xlu0 (!%p138_p2), %v1036_v0  ;;  %v1083_v5 = vsel (!%p138_p2), %vm284_vm1, %v285_v3, 0 }
   0x8   : > { %811 = vperm.xlu0 (!%p138_p2), %996, %v807_v1  }
   0xc   : > { %816 = vperm.xlu0 (!%p138_p2), %996, %v808_v4  }
   0xd   : > { %s1185_s13 = smov (!%p161_p3, %s932_s13), 1 }
   0xe   : > { %s984_s16 = smul.u32 160, %s1185_s13 }
   0xf   : > { %s985_s24 = smul.u32 40, %s1185_s13 }
  0x10   : > { %s1081_s21 = scalar_lea.vmem %s1180_s0, %s984_s16 }
  0x11   : > { %v997_v6 = vld [vmem:[%s1081_s21 + $0x4] ss:$80 sps:$4 sm:$0x1f]   ;;  %v999_v7 = vld [vmem:[%s1081_s21 + $0xc] ss:$80 sps:$4 sm:$0x1f]   ;;  %s170_s27 = scalar_lea.vmem %s1183_s3, %s985_s24 }
  0x12   : > { %v291_v8 = vand.u32 %v997_v6, %v1083_v5  ;;  %v1001_v9 = vld [vmem:[%s1081_s21] ss:$80 sps:$4 sm:$0x1f]   ;;  %v1002_v10 = vld [vmem:[%s1081_s21 + $0x8] ss:$80 sps:$4 sm:$0x1f]   ;;  %v297_v11 = vand.u32 %v999_v7, %v1083_v5 }
  0x13   : > { %v1004_v13 = vld [vmem:[%s1081_s21 + $0x10] ss:$80 sps:$4 sm:$0x1f]   ;;  %v288_v14 = vand.u32 %v1001_v9, %v1083_v5  ;;  %v294_v15 = vand.u32 %v1002_v10, %v1083_v5  ;;  %v1006_v16 = vld [vmem:[%s1081_s21 + $0x14] ss:$80 sps:$4 sm:$0x1f]  }
  0x14   : > { %347 = vmatprep.subr.bf16.mxu0 %v291_v8  ;;  %390 = vmatprep.subr.bf16.mxu1 %v297_v11  ;;  %v1007_v17 = vld [vmem:[%s1081_s21 + $0x18] ss:$80 sps:$4 sm:$0x1f]   ;;  %v1009_v18 = vld [vmem:[%s1081_s21 + $0x1c] ss:$80 sps:$4 sm:$0x1f]   ;;  %v303_v19 = vand.u32 %v1006_v16, %v1083_v5  ;;  %v300_v20 = vand.u32 %v1004_v13, %v1083_v5 }
  0x15   : > { %348 = vmatpush1.bf16.msra.mxu0 %v288_v14  ;;  %391 = vmatpush1.bf16.msra.mxu1 %v294_v15  ;;  %v309_v21 = vand.u32 %v1009_v18, %v1083_v5  ;;  %v306_v22 = vand.u32 %v1007_v17, %v1083_v5  ;;  %v1012_v23 = vld [vmem:[%s1081_s21 + $0x24] ss:$80 sps:$4 sm:$0x1f]   ;;  %v1015_v24 = vld [vmem:[%s1081_s21 + $0x2c] ss:$80 sps:$4 sm:$0x1f]  }
  0x16   : > { %433 = vmatprep.subr.bf16.mxu0 %v303_v19  ;;  %v1010_v25 = vld [vmem:[%s1081_s21 + $0x20] ss:$80 sps:$4 sm:$0x1f]   ;;  %v315_v26 = vand.u32 %v1012_v23, %v1083_v5  ;;  %v1013_v27 = vld [vmem:[%s1081_s21 + $0x28] ss:$80 sps:$4 sm:$0x1f]   ;;  %v321_v28 = vand.u32 %v1015_v24, %v1083_v5 }
  0x17   : > { %476 = vmatprep.subr.bf16.mxu1 %v309_v21  ;;  %v1018_v29 = vld [vmem:[%s1081_s21 + $0x34] ss:$80 sps:$4 sm:$0x1f]   ;;  %v1021_v30 = vld [vmem:[%s1081_s21 + $0x3c] ss:$80 sps:$4 sm:$0x1f]   ;;  %v312_v31 = vand.u32 %v1010_v25, %v1083_v5  ;;  %v318_v32 = vand.u32 %v1013_v27, %v1083_v5 }
  0x18   : > { %960 = vmatmul.mubr.msk.bf16.vlgmr.msra.gmra.mrb[0].mxu0 %vm279_vm2, %v1094_v12  ;;  %961 = vmatmul.mubr.msk.bf16.vlgmr.msra.gmra.mrb[0].mxu1 %vm279_vm2, %v1094_v12  ;;  %v327_v33 = vand.u32 %v1018_v29, %v1083_v5  ;;  %v333_v34 = vand.u32 %v1021_v30, %v1083_v5  ;;  %v1016_v35 = vld [vmem:[%s1081_s21 + $0x30] ss:$80 sps:$4 sm:$0x1f]   ;;  %v1019_v36 = vld [vmem:[%s1081_s21 + $0x38] ss:$80 sps:$4 sm:$0x1f]  }
  0x19   : > { %434 = vmatpush1.bf16.msra.mxu0 %v300_v20  ;;  %477 = vmatpush1.bf16.msra.mxu1 %v306_v22  ;;  %v1024_v37 = vld [vmem:[%s1081_s21 + $0x44] ss:$80 sps:$4 sm:$0x1f]   ;;  %v1027_v38 = vld [vmem:[%s1081_s21 + $0x4c] ss:$80 sps:$4 sm:$0x1f]   ;;  %v324_v39 = vand.u32 %v1016_v35, %v1083_v5  ;;  %v330_v40 = vand.u32 %v1019_v36, %v1083_v5 }
  0x1a   : > { %465 = vmatprep.mubr.bf16.mxu0 %v1036_v0  ;;  %508 = vmatprep.mubr.bf16.mxu1 %v1036_v0  ;;  %v339_v41 = vand.u32 %v1024_v37, %v1083_v5  ;;  %v345_v42 = vand.u32 %v1027_v38, %v1083_v5  ;;  %v1022_v43 = vld [vmem:[%s1081_s21 + $0x40] ss:$80 sps:$4 sm:$0x1f]   ;;  %v1025_v44 = vld [vmem:[%s1081_s21 + $0x48] ss:$80 sps:$4 sm:$0x1f]  }
  0x1b   : > { %519 = vmatprep.subr.bf16.mxu0 %v315_v26  ;;  %562 = vmatprep.subr.bf16.mxu1 %v321_v28  ;;  %v336_v45 = vand.u32 %v1022_v43, %v1083_v5  ;;  %v342_v46 = vand.u32 %v1025_v44, %v1083_v5 }
  0x20   : > { %962 = vmatmul.mubr.msk.bf16.vlgmr.msra.gmra.mrb[4].mxu0 %vm279_vm2, %v1094_v12  ;;  %963 = vmatmul.mubr.msk.bf16.vlgmr.msra.gmra.mrb[4].mxu1 %vm279_vm2, %v1094_v12 }
  0x21   : > { %520 = vmatpush1.bf16.msra.mxu0 %v312_v31  ;;  %563 = vmatpush1.bf16.msra.mxu1 %v318_v32 }
  0x22   : > { %551 = vmatprep.mubr.bf16.mxu0 %v1036_v0  ;;  %594 = vmatprep.mubr.bf16.mxu1 %v1036_v0 }
  0x23   : > { %605 = vmatprep.subr.bf16.mxu0 %v327_v33  ;;  %648 = vmatprep.subr.bf16.mxu1 %v333_v34 }
  0x28   : > { %964 = vmatmul.mubr.msk.bf16.vlgmr.msra.gmra.mrb[8].mxu0 %vm279_vm2, %v1094_v12  ;;  %965 = vmatmul.mubr.msk.bf16.vlgmr.msra.gmra.mrb[8].mxu1 %vm279_vm2, %v1094_v12 }
  0x29   : > { %606 = vmatpush1.bf16.msra.mxu0 %v324_v39  ;;  %649 = vmatpush1.bf16.msra.mxu1 %v330_v40 }
  0x2a   : > { %637 = vmatprep.mubr.bf16.mxu0 %v1036_v0  ;;  %680 = vmatprep.mubr.bf16.mxu1 %v1036_v0 }
  0x2b   : > { %691 = vmatprep.subr.bf16.mxu0 %v339_v41  ;;  %734 = vmatprep.subr.bf16.mxu1 %v345_v42 }
  0x30   : > { %966 = vmatmul.mubr.msk.bf16.vlgmr.msra.gmra.mrb[12].mxu0 %vm279_vm2, %v1094_v12  ;;  %967 = vmatmul.mubr.msk.bf16.vlgmr.msra.gmra.mrb[12].mxu1 %vm279_vm2, %v1094_v12 }
  0x31   : > { %692 = vmatpush1.bf16.msra.mxu0 %v336_v45  ;;  %735 = vmatpush1.bf16.msra.mxu1 %v342_v46 }
  0x32   : > { %723 = vmatprep.mubr.bf16.mxu0 %v1036_v0  ;;  %766 = vmatprep.mubr.bf16.mxu1 %v1036_v0 }
  0x38   : > { %968 = vmatmul.mubr.msk.bf16.vlgmr.msra.gmra.mrb[16].mxu0 %vm279_vm2, %v1094_v12  ;;  %969 = vmatmul.mubr.msk.bf16.vlgmr.msra.gmra.mrb[16].mxu1 %vm279_vm2, %v1094_v12 }
  0x87   : > { %v812_v17 = vpop.permute.xlu0 %811 }
  0x8b   : > { %v817_v31 = vpop.permute.xlu0 %816 }
  0xeb   : > { %v381_v47 = vpop.f32.mrb[0].mxu0  ;;  %v1158_v48 = vpop.f32.mrb[0].mxu1 }
  0xec   : > { %v383_v49 = vpop.f32.mrb[1].mxu0  ;;  %v426_v50 = vpop.f32.mrb[1].mxu1 }
  0xed   : > { %v385_v51 = vpop.f32.mrb[2].mxu0  ;;  %v1160_v52 = vpop.f32.mrb[2].mxu1 }
  0xee   : > { %v1162_v53 = vpop.f32.mrb[3].mxu0  ;;  %v1164_v54 = vpop.f32.mrb[3].mxu1 }
  0xf3   : > { %v467_v55 = vpop.f32.mrb[4].mxu0  ;;  %v510_v56 = vpop.f32.mrb[4].mxu1 }
  0xf4   : > { %v778_v57 = vmax.f32 %v383_v49, %v510_v56  ;;  %v469_v58 = vpop.f32.mrb[5].mxu0  ;;  %v512_v59 = vpop.f32.mrb[5].mxu1 }
  0xf5   : > { %v777_v60 = vmax.f32 %v381_v47, %v469_v58  ;;  %v779_v61 = vmax.f32 %v1158_v48, %v512_v59  ;;  %v1167_v62 = vpop.f32.mrb[6].mxu0  ;;  %v514_v63 = vpop.f32.mrb[6].mxu1 }
  0xf6   : > { %v783_v0 = vmax.f32 %v1162_v53, %v514_v63  ;;  %v473_v1 = vpop.f32.mrb[7].mxu0  ;;  %v516_v2 = vpop.f32.mrb[7].mxu1 }
  0xf7   : > { %v782_v3 = vmax.f32 %v385_v51, %v473_v1  ;;  %v784_v4 = vmax.f32 %v1160_v52, %v516_v2 }
  0xfb   : > { %v553_v5 = vpop.f32.mrb[8].mxu0  ;;  %v596_v6 = vpop.f32.mrb[8].mxu1 }
  0xfc   : > { %v780_v7 = vmax.f32 %v426_v50, %v553_v5  ;;  %v555_v8 = vpop.f32.mrb[9].mxu0  ;;  %v598_v9 = vpop.f32.mrb[9].mxu1 }
  0xfd   : > { %v781_v10 = vmax.f32 %v467_v55, %v555_v8  ;;  %v557_v11 = vpop.f32.mrb[10].mxu0  ;;  %v600_v12 = vpop.f32.mrb[10].mxu1 }
  0xfe   : > { %v785_v13 = vmax.f32 %v1164_v54, %v557_v11  ;;  %v559_v14 = vpop.f32.mrb[11].mxu0  ;;  %v602_v15 = vpop.f32.mrb[11].mxu1 }
  0xff   : > { %v786_v16 = vmax.f32 %v1167_v62, %v559_v14 }
 0x103   : > { %v639_v18 = vpop.f32.mrb[12].mxu0  ;;  %v682_v19 = vpop.f32.mrb[12].mxu1 }
 0x104   : > { %v641_v20 = vpop.f32.mrb[13].mxu0  ;;  %v684_v21 = vpop.f32.mrb[13].mxu1 }
 0x105   : > { %v787_v22 = vmax.f32 %v596_v6, %v684_v21  ;;  %v643_v23 = vpop.f32.mrb[14].mxu0  ;;  %v686_v24 = vpop.f32.mrb[14].mxu1 }
 0x106   : > { %v645_v25 = vpop.f32.mrb[15].mxu0  ;;  %v688_v26 = vpop.f32.mrb[15].mxu1 }
 0x107   : > { %v797_v27 = vmax.f32 %v777_v60, %v787_v22  ;;  %v792_v28 = vmax.f32 %v600_v12, %v688_v26 }
 0x109   : > { %v819_v29 = vadd.f32 %v812_v17, %v797_v27  ;;  %v802_v30 = vmax.f32 %v782_v3, %v792_v28 }
 0x10b   : > { %v725_v32 = vpop.f32.mrb[16].mxu0  ;;  %v768_v33 = vpop.f32.mrb[16].mxu1  ;;  %v824_v38 = vadd.f32 %v817_v31, %v802_v30  ;;  %v829_v39 = vmax.f32 %v819_v29, 0.0 }
 0x10c   : > { %v788_v34 = vmax.f32 %v598_v9, %v725_v32  ;;  %v790_v35 = vmax.f32 %v641_v20, %v768_v33  ;;  %v727_v36 = vpop.f32.mrb[17].mxu0  ;;  %v770_v37 = vpop.f32.mrb[17].mxu1 }
 0x10d   : > { %v789_v40 = vmax.f32 %v639_v18, %v727_v36  ;;  %v791_v41 = vmax.f32 %v682_v19, %v770_v37  ;;  %v729_v42 = vpop.f32.mrb[18].mxu0  ;;  %v772_v43 = vpop.f32.mrb[18].mxu1  ;;  %v834_v8 = vmax.f32 %v824_v38, 0.0 }
 0x10e   : > { %v798_v44 = vmax.f32 %v778_v57, %v788_v34  ;;  %v800_v45 = vmax.f32 %v780_v7, %v790_v35  ;;  %v793_v46 = vmax.f32 %v602_v15, %v729_v42  ;;  %v795_v47 = vmax.f32 %v645_v25, %v772_v43  ;;  %v731_v48 = vpop.f32.mrb[19].mxu0  ;;  %v774_v49 = vpop.f32.mrb[19].mxu1 }
 0x10f   : > { %v799_v50 = vmax.f32 %v779_v61, %v789_v40  ;;  %v801_v51 = vmax.f32 %v781_v10, %v791_v41  ;;  %v794_v52 = vmax.f32 %v643_v23, %v731_v48  ;;  %v796_v53 = vmax.f32 %v686_v24, %v774_v49 }
 0x110   : > { %v820_v54 = vadd.f32 %v812_v17, %v798_v44  ;;  %v822_v55 = vadd.f32 %v812_v17, %v800_v45  ;;  %v803_v56 = vmax.f32 %v783_v0, %v793_v46  ;;  %v805_v58 = vmax.f32 %v785_v13, %v795_v47 }
 0x111   : > { %v821_v59 = vadd.f32 %v812_v17, %v799_v50  ;;  %v823_v60 = vadd.f32 %v812_v17, %v801_v51  ;;  %v804_v62 = vmax.f32 %v784_v4, %v794_v52  ;;  %v806_v63 = vmax.f32 %v786_v16, %v796_v53 }
 0x112   : > { %v830_v1 = vmax.f32 %v820_v54, 0.0  ;;  %v832_v57 = vmax.f32 %v822_v55, 0.0  ;;  %v825_v2 = vadd.f32 %v817_v31, %v803_v56  ;;  %v827_v3 = vadd.f32 %v817_v31, %v805_v58 }
 0x113   : > { %v831_v61 = vmax.f32 %v821_v59, 0.0  ;;  %v833_v5 = vmax.f32 %v823_v60, 0.0  ;;  %v826_v6 = vadd.f32 %v817_v31, %v804_v62  ;;  %v828_v7 = vadd.f32 %v817_v31, %v806_v63 }
 0x114   : > { %v978_v9 = vpack.c.bf16 %v830_v1, %v829_v39  ;;  %v835_v0 = vmax.f32 %v825_v2, 0.0  ;;  %v837_v10 = vmax.f32 %v827_v3, 0.0 }
 0x115   : > { %v979_v11 = vpack.c.bf16 %v832_v57, %v831_v61  ;;  %v980_v12 = vpack.c.bf16 %v833_v5, %v833_v5  ;;  %v836_v4 = vmax.f32 %v826_v6, 0.0  ;;  %v838_v13 = vmax.f32 %v828_v7, 0.0 }
 0x116   : > { %871 = vst [vmem:[%s170_s27] sm:$0xff] %v978_v9  ;;  %v981_v14 = vpack.c.bf16 %v835_v0, %v834_v8 }
 0x117   : > { %872 = vst [vmem:[%s170_s27 + $0x8] sm:$0xff] %v979_v11  ;;  %873 = vst [vmem:[%s170_s27 + $0x10] sm:$0xf] %v980_v12  ;;  %v982_v15 = vpack.c.bf16 %v837_v10, %v836_v4  ;;  %v983_v16 = vpack.c.bf16 %v838_v13, %v838_v13 }
 0x118   : > { %874 = vst [vmem:[%s170_s27 + $0x14] sm:$0xff] %v981_v14 }
 0x119   : > { %875 = vst [vmem:[%s170_s27 + $0x1c] sm:$0xff] %v982_v15  ;;  %876 = vst [vmem:[%s170_s27 + $0x24] sm:$0xf] %v983_v16 }
 0x11a PF: > { %s13_s12 = sadd.s32 1, %s1034_s12  }
 0x11b   : > { %p10_p4 = scmp.ge.s32.totalorder %s13_s12, 4  }
 0x11d   :  { %12 = sbr.rel (!%p10_p4) target bundleno = 1 (0x1), region = 62 }

// kernel: cnn_forward.3
= control target key start
LH: loop header
LB: loop body
LE: loop exit
PB: predicated region body
PF: predicated region fallthrough
CT: control target
= control target key end

     0   :  { %s1532_s18 = smov 0   ;;  %s1936_s0 = inlined_call_operand.vmem [shape: bf16[2,144,1024], index: 0, kind: input, shape index: {}]   ;;  %s1937_s1 = inlined_call_operand.vmem [shape: bf16[32,144], index: 1, kind: input, shape index: {}]   ;;  %s1938_s2 = inlined_call_operand.vmem [shape: f32[32,1], index: 2, kind: input, shape index: {}]   ;;  %s1939_s3 = inlined_call_operand.vmem [shape: f32[6,32,256], index: 3, kind: input, shape index: {}]   ;;  %s1940_s4 = inlined_call_operand.vmem [shape: f32[6,1], index: 4, kind: input, shape index: {}]   ;;  %s1941_s5 = inlined_call_operand.vmem [shape: f32[2,6,1], index: 5, kind: output, shape index: {}]  }
   0x1 LB: > { %s1374_s19 = sadd.s32 4294967295, %s1499_s18   ;;  %p1378_p0 = scmp.ge.s32.totalorder %s1499_s18, 1  ;;  %s1499_s18 = sphi %s1532_s18, %s15_s18  }
   0x2   : > { %p187_p1 = scmp.lt.s32.totalorder %s1499_s18, 3 }
   0x4   : > { %p188_p2 = pnand %p1378_p0, %p187_p1 }
   0x5   : > { %p214_p3 = scmp.lt.s32.totalorder (!%p188_p2), %s1374_s19, 1  ;;  %v1543_v0 = vld [vmem:[%s1937_s1 + $0x4] ss:$8 sps:$4 sm:$0xff] (!%p188_p2)   ;;  %vm678_vm0 = vcmask (!%p188_p2), 130048   ;;  %v1501_v2 = vmov (!%p188_p2), 0   ;;  %v923_v3 = vld [vmem:[%s1938_s2 + $0x10] sm:$0xff] (!%p188_p2) }
   0x6   : > { %191 = sbr.rel (%p188_p2) target bundleno = 1098 (0x44a), region = 40  ;;  %1457 = vmatprep.mubr.msk.bf16.mxu0 (!%p188_p2), %vm678_vm0, %v1543_v0  ;;  %1459 = vmatprep.mubr.msk.bf16.mxu1 (!%p188_p2), %vm678_vm0, %v1543_v0  ;;  %v921_v1 = vld [vmem:[%s1938_s2] sm:$0xff] (!%p188_p2)  ;;  %v922_v4 = vld [vmem:[%s1938_s2 + $0x8] sm:$0xff] (!%p188_p2)  ;;  %v924_v5 = vld [vmem:[%s1938_s2 + $0x18] sm:$0xff] (!%p188_p2)  ;;  %vm1164_vm1 = vcmask (!%p188_p2), 130112   ;;  %vm1171_vm2 = vcmask (!%p188_p2), 195712  }
   0x7   : > { %1481 = vset.pattern.permute.xlu0 (!%p188_p2), %v1501_v2  ;;  %1482 = vset.pattern.permute.xlu1 (!%p188_p2), %v1501_v2  ;;  %vm1178_vm3 = vcmask (!%p188_p2), 261312   ;;  %vm1275_vm4 = vcmask (!%p188_p2), 1041409   ;;  %vm1277_vm5 = vcmask (!%p188_p2), 1042434   ;;  %vm1279_vm6 = vcmask (!%p188_p2), 1043459  }
   0x8   : > { %927 = vperm.xlu0 (!%p188_p2), %1481, %v921_v1   ;;  %937 = vperm.xlu1 (!%p188_p2), %1482, %v923_v3   ;;  %vm1281_vm7 = vcmask (!%p188_p2), 1044484   ;;  %vm1283_vm8 = vcmask (!%p188_p2), 1045509   ;;  %vm1286_vm9 = vcmask (!%p188_p2), 259072   ;;  %vm1292_vm10 = vcmask (!%p188_p2), 5120  }
   0xc   : > { %932 = vperm.xlu0 (!%p188_p2), %1481, %v922_v4   ;;  %942 = vperm.xlu1 (!%p188_p2), %1482, %v924_v5  }
   0xd   : > { %s1943_s19 = smov (!%p214_p3, %s1374_s19), 1 }
   0xe   : > { %s1467_s26 = smul.u32 576, %s1943_s19  ;;  %s1380_s25 = sshll.u32 %s1943_s19, 3 }
   0xf   : > { %s222_s28 = scalar_lea.vmem %s1941_s5, %s1380_s25 }
  0x10   : > { %s1567_s8 = scalar_lea.vmem %s1936_s0, %s1467_s26 }
  0x11   : > { %v228_v6 = vld [vmem:[%s1567_s8] sm:$0xff]  ;;  %v229_v8 = vld [vmem:[%s1567_s8 + $0x8] sm:$0xff] }
  0x12   : > { %v232_v7 = vld [vmem:[%s1567_s8 + $0x20] sm:$0xff]  ;;  %v233_v10 = vld [vmem:[%s1567_s8 + $0x28] sm:$0xff] }
  0x13   : > { %v1386_v9 = vcombine.high %v228_v6, %v232_v7  ;;  %v1385_v11 = vcombine.low %v228_v6, %v232_v7  ;;  %v236_v12 = vld [vmem:[%s1567_s8 + $0x40] sm:$0xff]  ;;  %v1388_v14 = vcombine.high %v229_v8, %v233_v10  ;;  %v1387_v15 = vcombine.low %v229_v8, %v233_v10  ;;  %v237_v17 = vld [vmem:[%s1567_s8 + $0x48] sm:$0xff] }
  0x14   : > { %v240_v13 = vld [vmem:[%s1567_s8 + $0x60] sm:$0xff]  ;;  %v241_v18 = vld [vmem:[%s1567_s8 + $0x68] sm:$0xff] }
  0x15   : > { %v1394_v16 = vcombine.high %v236_v12, %v240_v13  ;;  %v244_v19 = vld [vmem:[%s1567_s8 + $0x80] sm:$0xff]  ;;  %685 = vmatprep.subr.bf16.mxu0 %v1386_v9  ;;  %v1396_v20 = vcombine.high %v237_v17, %v241_v18  ;;  %v245_v22 = vld [vmem:[%s1567_s8 + $0x88] sm:$0xff]  ;;  %738 = vmatprep.subr.bf16.mxu1 %v1388_v14  ;;  %v1393_v24 = vcombine.low %v236_v12, %v240_v13  ;;  %v230_v13 = vld [vmem:[%s1567_s8 + $0x10] sm:$0xff] }
  0x16   : > { %v248_v21 = vld [vmem:[%s1567_s8 + $0xa0] sm:$0xff]  ;;  %v249_v23 = vld [vmem:[%s1567_s8 + $0xa8] sm:$0xff]  ;;  %686 = vmatpush1.bf16.msra.mxu0 %v1385_v11  ;;  %739 = vmatpush1.bf16.msra.mxu1 %v1387_v15  ;;  %v1395_v25 = vcombine.low %v237_v17, %v241_v18  ;;  %v234_v14 = vld [vmem:[%s1567_s8 + $0x30] sm:$0xff] }
  0x17   : > { %687 = vmatprep.subr.bf16.mxu0 %v1394_v16  ;;  %v1402_v26 = vcombine.high %v244_v19, %v248_v21  ;;  %740 = vmatprep.subr.bf16.mxu1 %v1396_v20  ;;  %v1404_v27 = vcombine.high %v245_v22, %v249_v23  ;;  %v252_v28 = vld [vmem:[%s1567_s8 + $0xc0] sm:$0xff]  ;;  %v253_v30 = vld [vmem:[%s1567_s8 + $0xc8] sm:$0xff]  ;;  %v1401_v32 = vcombine.low %v244_v19, %v248_v21  ;;  %v231_v15 = vld [vmem:[%s1567_s8 + $0x18] sm:$0xff] }
  0x18   : > { %v256_v29 = vld [vmem:[%s1567_s8 + $0xe0] sm:$0xff]  ;;  %v257_v31 = vld [vmem:[%s1567_s8 + $0xe8] sm:$0xff]  ;;  %v1403_v33 = vcombine.low %v245_v22, %v249_v23  ;;  %v235_v16 = vld [vmem:[%s1567_s8 + $0x38] sm:$0xff]  ;;  %v1390_v19 = vcombine.high %v230_v13, %v234_v14 }
  0x19   : > { %v1410_v34 = vcombine.high %v252_v28, %v256_v29  ;;  %v1412_v35 = vcombine.high %v253_v30, %v257_v31  ;;  %v260_v36 = vld [vmem:[%s1567_s8 + $0x100] sm:$0xff]  ;;  %v261_v38 = vld [vmem:[%s1567_s8 + $0x108] sm:$0xff]  ;;  %v1409_v40 = vcombine.low %v252_v28, %v256_v29  ;;  %v1411_v41 = vcombine.low %v253_v30, %v257_v31  ;;  %v238_v21 = vld [vmem:[%s1567_s8 + $0x50] sm:$0xff] }
  0x1a   : > { %688 = vmatpush1.bf16.msra.mxu0 %v1393_v24  ;;  %741 = vmatpush1.bf16.msra.mxu1 %v1395_v25  ;;  %v264_v37 = vld [vmem:[%s1567_s8 + $0x120] sm:$0xff]  ;;  %v265_v39 = vld [vmem:[%s1567_s8 + $0x128] sm:$0xff]  ;;  %v1392_v20 = vcombine.high %v231_v15, %v235_v16  ;;  %v242_v22 = vld [vmem:[%s1567_s8 + $0x70] sm:$0xff] }
  0x1b   : > { %689 = vmatprep.subr.bf16.mxu0 %v1402_v26  ;;  %742 = vmatprep.subr.bf16.mxu1 %v1404_v27  ;;  %v1418_v42 = vcombine.high %v260_v36, %v264_v37  ;;  %v1420_v43 = vcombine.high %v261_v38, %v265_v39  ;;  %v268_v44 = vld [vmem:[%s1567_s8 + $0x140] sm:$0xff]  ;;  %v269_v46 = vld [vmem:[%s1567_s8 + $0x148] sm:$0xff]  ;;  %v1417_v48 = vcombine.low %v260_v36, %v264_v37  ;;  %v239_v24 = vld [vmem:[%s1567_s8 + $0x58] sm:$0xff] }
  0x1c   : > { %v272_v45 = vld [vmem:[%s1567_s8 + $0x160] sm:$0xff]  ;;  %v273_v47 = vld [vmem:[%s1567_s8 + $0x168] sm:$0xff]  ;;  %v1419_v49 = vcombine.low %v261_v38, %v265_v39  ;;  %v243_v25 = vld [vmem:[%s1567_s8 + $0x78] sm:$0xff]  ;;  %v1389_v26 = vcombine.low %v230_v13, %v234_v14  ;;  %v1391_v27 = vcombine.low %v231_v15, %v235_v16  ;;  %v1398_v28 = vcombine.high %v238_v21, %v242_v22 }
  0x1d   : > { %v1426_v50 = vcombine.high %v268_v44, %v272_v45  ;;  %v1428_v51 = vcombine.high %v269_v46, %v273_v47  ;;  %v276_v52 = vld [vmem:[%s1567_s8 + $0x180] sm:$0xff]  ;;  %v277_v54 = vld [vmem:[%s1567_s8 + $0x188] sm:$0xff]  ;;  %v1425_v56 = vcombine.low %v268_v44, %v272_v45  ;;  %v1427_v57 = vcombine.low %v269_v46, %v273_v47  ;;  %v246_v30 = vld [vmem:[%s1567_s8 + $0x90] sm:$0xff] }
  0x1e   : > { %690 = vmatpush1.bf16.msra.mxu0 %v1401_v32  ;;  %743 = vmatpush1.bf16.msra.mxu1 %v1403_v33  ;;  %v280_v53 = vld [vmem:[%s1567_s8 + $0x1a0] sm:$0xff]  ;;  %v281_v55 = vld [vmem:[%s1567_s8 + $0x1a8] sm:$0xff]  ;;  %v1400_v29 = vcombine.high %v239_v24, %v243_v25  ;;  %v250_v31 = vld [vmem:[%s1567_s8 + $0xb0] sm:$0xff]  ;;  %v1399_v36 = vcombine.low %v239_v24, %v243_v25 }
  0x1f   : > { %691 = vmatprep.subr.bf16.mxu0 %v1410_v34  ;;  %744 = vmatprep.subr.bf16.mxu1 %v1412_v35  ;;  %v1434_v58 = vcombine.high %v276_v52, %v280_v53  ;;  %v1436_v59 = vcombine.high %v277_v54, %v281_v55  ;;  %v284_v60 = vld [vmem:[%s1567_s8 + $0x1c0] sm:$0xff]  ;;  %v285_v62 = vld [vmem:[%s1567_s8 + $0x1c8] sm:$0xff]  ;;  %v1433_v1 = vcombine.low %v276_v52, %v280_v53  ;;  %v1623_v32 = vld [vmem:[%s1937_s1 + $0x14] ss:$8 sps:$4 sm:$0xff]  }
  0x20   : > { %v288_v61 = vld [vmem:[%s1567_s8 + $0x1e0] sm:$0xff]  ;;  %v289_v63 = vld [vmem:[%s1567_s8 + $0x1e8] sm:$0xff]  ;;  %v1435_v2 = vcombine.low %v277_v54, %v281_v55  ;;  %v247_v33 = vld [vmem:[%s1567_s8 + $0x98] sm:$0xff]  ;;  %v1397_v35 = vcombine.low %v238_v21, %v242_v22  ;;  %v1406_v37 = vcombine.high %v246_v30, %v250_v31  ;;  %v1405_v44 = vcombine.low %v246_v30, %v250_v31 }
  0x21   : > { %v1442_v3 = vcombine.high %v284_v60, %v288_v61  ;;  %v1444_v4 = vcombine.high %v285_v62, %v289_v63  ;;  %v292_v5 = vld [vmem:[%s1567_s8 + $0x200] sm:$0xff]  ;;  %v293_v7 = vld [vmem:[%s1567_s8 + $0x208] sm:$0xff]  ;;  %v1441_v9 = vcombine.low %v284_v60, %v288_v61  ;;  %v1443_v10 = vcombine.low %v285_v62, %v289_v63  ;;  %v251_v34 = vld [vmem:[%s1567_s8 + $0xb8] sm:$0xff] }
  0x22   : > { %692 = vmatpush1.bf16.msra.mxu0 %v1409_v40  ;;  %745 = vmatpush1.bf16.msra.mxu1 %v1411_v41  ;;  %v296_v6 = vld [vmem:[%s1567_s8 + $0x220] sm:$0xff]  ;;  %v297_v8 = vld [vmem:[%s1567_s8 + $0x228] sm:$0xff]  ;;  %v1408_v38 = vcombine.high %v247_v33, %v251_v34  ;;  %v254_v39 = vld [vmem:[%s1567_s8 + $0xd0] sm:$0xff]  ;;  %v1407_v45 = vcombine.low %v247_v33, %v251_v34 }
  0x23   : > { %693 = vmatprep.subr.bf16.mxu0 %v1418_v42  ;;  %746 = vmatprep.subr.bf16.mxu1 %v1420_v43  ;;  %v1450_v11 = vcombine.high %v292_v5, %v296_v6  ;;  %v1452_v12 = vcombine.high %v293_v7, %v297_v8  ;;  %v1449_v17 = vcombine.low %v292_v5, %v296_v6  ;;  %v1614_v23 = vld [vmem:[%s1937_s1] ss:$8 sps:$4 sm:$0xff]   ;;  %v258_v40 = vld [vmem:[%s1567_s8 + $0xf0] sm:$0xff]  ;;  %v255_v41 = vld [vmem:[%s1567_s8 + $0xd8] sm:$0xff] }
  0x24   : > { %v1451_v18 = vcombine.low %v293_v7, %v297_v8  ;;  %v259_v42 = vld [vmem:[%s1567_s8 + $0xf8] sm:$0xff]  ;;  %v1414_v46 = vcombine.high %v254_v39, %v258_v40  ;;  %v1413_v52 = vcombine.low %v254_v39, %v258_v40  ;;  %v286_v8 = vld [vmem:[%s1567_s8 + $0x1d0] sm:$0xff] }
  0x25   : > { %v1640_v43 = vld [vmem:[%s1937_s1 + $0x10] ss:$8 sps:$4 sm:$0xff]   ;;  %v1416_v47 = vcombine.high %v255_v41, %v259_v42  ;;  %v1415_v53 = vcombine.low %v255_v41, %v259_v42 }
  0x26   : > { %694 = vmatpush1.bf16.msra.mxu0 %v1417_v48  ;;  %747 = vmatpush1.bf16.msra.mxu1 %v1419_v49  ;;  %v262_v48 = vld [vmem:[%s1567_s8 + $0x110] sm:$0xff] }
  0x27   : > { %695 = vmatprep.subr.bf16.mxu0 %v1426_v50  ;;  %748 = vmatprep.subr.bf16.mxu1 %v1428_v51  ;;  %v266_v49 = vld [vmem:[%s1567_s8 + $0x130] sm:$0xff]  ;;  %v263_v50 = vld [vmem:[%s1567_s8 + $0x118] sm:$0xff] }
  0x28   : > { %v267_v51 = vld [vmem:[%s1567_s8 + $0x138] sm:$0xff]  ;;  %v1422_v54 = vcombine.high %v262_v48, %v266_v49  ;;  %v1421_v60 = vcombine.low %v262_v48, %v266_v49  ;;  %v294_v16 = vld [vmem:[%s1567_s8 + $0x210] sm:$0xff] }
  0x29   : > { %v1424_v55 = vcombine.high %v263_v50, %v267_v51  ;;  %v1423_v61 = vcombine.low %v263_v50, %v267_v51 }
  0x2a   : > { %696 = vmatpush1.bf16.msra.mxu0 %v1425_v56  ;;  %749 = vmatpush1.bf16.msra.mxu1 %v1427_v57  ;;  %v270_v56 = vld [vmem:[%s1567_s8 + $0x150] sm:$0xff] }
  0x2b   : > { %697 = vmatprep.subr.bf16.mxu0 %v1434_v58  ;;  %750 = vmatprep.subr.bf16.mxu1 %v1436_v59  ;;  %v274_v57 = vld [vmem:[%s1567_s8 + $0x170] sm:$0xff]  ;;  %v271_v58 = vld [vmem:[%s1567_s8 + $0x158] sm:$0xff] }
  0x2c   : > { %v275_v59 = vld [vmem:[%s1567_s8 + $0x178] sm:$0xff]  ;;  %v1430_v62 = vcombine.high %v270_v56, %v274_v57  ;;  %v1429_v5 = vcombine.low %v270_v56, %v274_v57 }
  0x2d   : > { %v1432_v63 = vcombine.high %v271_v58, %v275_v59 }
  0x2e   : > { %698 = vmatpush1.bf16.msra.mxu0 %v1433_v1  ;;  %751 = vmatpush1.bf16.msra.mxu1 %v1435_v2  ;;  %v278_v1 = vld [vmem:[%s1567_s8 + $0x190] sm:$0xff] }
  0x2f   : > { %699 = vmatprep.subr.bf16.mxu0 %v1442_v3  ;;  %752 = vmatprep.subr.bf16.mxu1 %v1444_v4  ;;  %v282_v2 = vld [vmem:[%s1567_s8 + $0x1b0] sm:$0xff]  ;;  %v279_v3 = vld [vmem:[%s1567_s8 + $0x198] sm:$0xff] }
  0x30   : > { %v283_v4 = vld [vmem:[%s1567_s8 + $0x1b8] sm:$0xff]  ;;  %v1438_v6 = vcombine.high %v278_v1, %v282_v2 }
  0x31   : > { %v1440_v7 = vcombine.high %v279_v3, %v283_v4  ;;  %v1439_v13 = vcombine.low %v279_v3, %v283_v4 }
  0x32   : > { %700 = vmatpush1.bf16.msra.mxu0 %v1441_v9  ;;  %753 = vmatpush1.bf16.msra.mxu1 %v1443_v10  ;;  %v290_v9 = vld [vmem:[%s1567_s8 + $0x1f0] sm:$0xff]  ;;  %v287_v10 = vld [vmem:[%s1567_s8 + $0x1d8] sm:$0xff] }
  0x33   : > { %701 = vmatprep.subr.bf16.mxu0 %v1450_v11  ;;  %754 = vmatprep.subr.bf16.mxu1 %v1452_v12  ;;  %v291_v11 = vld [vmem:[%s1567_s8 + $0x1f8] sm:$0xff]  ;;  %v1437_v12 = vcombine.low %v278_v1, %v282_v2  ;;  %v1446_v14 = vcombine.high %v286_v8, %v290_v9 }
  0x34   : > { %v1448_v15 = vcombine.high %v287_v10, %v291_v11  ;;  %v1447_v21 = vcombine.low %v287_v10, %v291_v11 }
  0x36   : > { %702 = vmatpush1.bf16.msra.mxu0 %v1449_v17  ;;  %755 = vmatpush1.bf16.msra.mxu1 %v1451_v18  ;;  %v298_v17 = vld [vmem:[%s1567_s8 + $0x230] sm:$0xff]  ;;  %v295_v18 = vld [vmem:[%s1567_s8 + $0x218] sm:$0xff] }
  0x37   : > { %791 = vmatprep.subr.bf16.mxu0 %v1390_v19  ;;  %844 = vmatprep.subr.bf16.mxu1 %v1392_v20  ;;  %v299_v19 = vld [vmem:[%s1567_s8 + $0x238] sm:$0xff]  ;;  %v1445_v20 = vcombine.low %v286_v8, %v290_v9  ;;  %v1454_v22 = vcombine.high %v294_v16, %v298_v17  ;;  %v1453_v25 = vcombine.low %v294_v16, %v298_v17  ;;  %v961_v8 = vld [vmem:[%s1939_s3] sm:$0xff] }
  0x38   : > { %v1456_v24 = vcombine.high %v295_v18, %v299_v19 }
  0x39   : > { %718 = vmatmul.mubr.bf16.vlgmr.msra.gmra.mrb[0].mxu0 %v1614_v23  ;;  %771 = vmatmul.mubr.bf16.vlgmr.msra.gmra.mrb[0].mxu1 %v1614_v23 }
  0x3a   : > { %792 = vmatpush1.bf16.msra.mxu0 %v1389_v26  ;;  %845 = vmatpush1.bf16.msra.mxu1 %v1391_v27  ;;  %v1455_v26 = vcombine.low %v295_v18, %v299_v19  ;;  %v969_v18 = vld [vmem:[%s1939_s3 + $0x40] sm:$0xff]  ;;  %v970_v19 = vld [vmem:[%s1939_s3 + $0x48] sm:$0xff] }
  0x3b   : > { %793 = vmatprep.subr.bf16.mxu0 %v1398_v28  ;;  %846 = vmatprep.subr.bf16.mxu1 %v1400_v29 }
  0x3c   : > { %1458 = vmatprep.mubr.msk.bf16.mxu0 %vm678_vm0, %v1623_v32  ;;  %1460 = vmatprep.mubr.msk.bf16.mxu1 %vm678_vm0, %v1623_v32 }
  0x3e   : > { %794 = vmatpush1.bf16.msra.mxu0 %v1397_v35  ;;  %847 = vmatpush1.bf16.msra.mxu1 %v1399_v36 }
  0x3f   : > { %795 = vmatprep.subr.bf16.mxu0 %v1406_v37  ;;  %848 = vmatprep.subr.bf16.mxu1 %v1408_v38 }
  0x41   : > { %728 = vmatmul.mubr.bf16.gmra.mrb[4].mxu0 %v1640_v43  ;;  %781 = vmatmul.mubr.bf16.gmra.mrb[4].mxu1 %v1640_v43 }
  0x42   : > { %796 = vmatpush1.bf16.msra.mxu0 %v1405_v44  ;;  %849 = vmatpush1.bf16.msra.mxu1 %v1407_v45 }
  0x43   : > { %797 = vmatprep.subr.bf16.mxu0 %v1414_v46  ;;  %850 = vmatprep.subr.bf16.mxu1 %v1416_v47 }
  0x44   : > { %1461 = vmatprep.mubr.msk.bf16.mxu0 %vm678_vm0, %v1543_v0  ;;  %1463 = vmatprep.mubr.msk.bf16.mxu1 %vm678_vm0, %v1543_v0  ;;  %v1431_v0 = vcombine.low %v271_v58, %v275_v59 }
  0x46   : > { %798 = vmatpush1.bf16.msra.mxu0 %v1413_v52  ;;  %851 = vmatpush1.bf16.msra.mxu1 %v1415_v53 }
  0x47   : > { %799 = vmatprep.subr.bf16.mxu0 %v1422_v54  ;;  %852 = vmatprep.subr.bf16.mxu1 %v1424_v55 }
  0x4a   : > { %800 = vmatpush1.bf16.msra.mxu0 %v1421_v60  ;;  %853 = vmatpush1.bf16.msra.mxu1 %v1423_v61 }
  0x4b   : > { %801 = vmatprep.subr.bf16.mxu0 %v1430_v62  ;;  %854 = vmatprep.subr.bf16.mxu1 %v1432_v63 }
  0x4e   : > { %802 = vmatpush1.bf16.msra.mxu0 %v1429_v5  ;;  %855 = vmatpush1.bf16.msra.mxu1 %v1431_v0 }
  0x4f   : > { %803 = vmatprep.subr.bf16.mxu0 %v1438_v6  ;;  %856 = vmatprep.subr.bf16.mxu1 %v1440_v7  ;;  %v977_v7 = vld [vmem:[%s1939_s3 + $0x80] sm:$0xff] }
  0x52   : > { %804 = vmatpush1.bf16.msra.mxu0 %v1437_v12  ;;  %857 = vmatpush1.bf16.msra.mxu1 %v1439_v13  ;;  %v978_v12 = vld [vmem:[%s1939_s3 + $0x88] sm:$0xff] }
  0x53   : > { %805 = vmatprep.subr.bf16.mxu0 %v1446_v14  ;;  %858 = vmatprep.subr.bf16.mxu1 %v1448_v15  ;;  %v962_v13 = vld [vmem:[%s1939_s3 + $0x8] sm:$0xff] }
  0x56   : > { %806 = vmatpush1.bf16.msra.mxu0 %v1445_v20  ;;  %859 = vmatpush1.bf16.msra.mxu1 %v1447_v21 }
  0x57   : > { %807 = vmatprep.subr.bf16.mxu0 %v1454_v22  ;;  %860 = vmatprep.subr.bf16.mxu1 %v1456_v24 }
  0x5a   : > { %808 = vmatpush1.bf16.msra.mxu0 %v1453_v25  ;;  %861 = vmatpush1.bf16.msra.mxu1 %v1455_v26 }
  0x5d   : > { %824 = vmatmul.mubr.bf16.vlgmr.msra.gmra.mrb[8].mxu0 %v1614_v23  ;;  %877 = vmatmul.mubr.bf16.vlgmr.msra.gmra.mrb[8].mxu1 %v1614_v23 }
  0x5e   : > { %1462 = vmatprep.mubr.msk.bf16.mxu0 %vm678_vm0, %v1623_v32  ;;  %1464 = vmatprep.mubr.msk.bf16.mxu1 %vm678_vm0, %v1623_v32 }
  0x65   : > { %834 = vmatmul.mubr.bf16.gmra.mrb[12].mxu0 %v1640_v43  ;;  %887 = vmatmul.mubr.bf16.gmra.mrb[12].mxu1 %v1640_v43 }
  0x87   : > { %v928_v50 = vpop.permute.xlu0 %927  ;;  %v938_v6 = vpop.permute.xlu1 %937 }
  0x8b   : > { %v933_v2 = vpop.permute.xlu0 %932 }
 0x10c   : > { %v719_v27 = vpop.f32.mrb[0].mxu0  ;;  %v772_v28 = vpop.f32.mrb[0].mxu1 }
 0x10d   : > { %v721_v29 = vpop.f32.mrb[1].mxu0  ;;  %v897_v30 = vmax.f32 %v719_v27, %v772_v28  ;;  %v774_v31 = vpop.f32.mrb[1].mxu1 }
 0x10e   : > { %v723_v33 = vpop.f32.mrb[2].mxu0  ;;  %v898_v34 = vmax.f32 %v721_v29, %v774_v31  ;;  %v776_v35 = vpop.f32.mrb[2].mxu1 }
 0x10f   : > { %v725_v36 = vpop.f32.mrb[3].mxu0  ;;  %v899_v23 = vmax.f32 %v723_v33, %v776_v35  ;;  %v778_v37 = vpop.f32.mrb[3].mxu1 }
 0x110   : > { %v900_v38 = vmax.f32 %v725_v36, %v778_v37 }
 0x114   : > { %v729_v39 = vpop.f32.mrb[4].mxu0  ;;  %v782_v40 = vpop.f32.mrb[4].mxu1 }
 0x115   : > { %v1676_v41 = vpop.f32.mrb[5].mxu0  ;;  %v901_v32 = vmax.f32 %v729_v39, %v782_v40  ;;  %v784_v42 = vpop.f32.mrb[5].mxu1  ;;  %v964_v39 = vld [vmem:[%s1939_s3 + $0x18] sm:$0xff] }
 0x116   : > { %v1678_v44 = vpop.f32.mrb[6].mxu0  ;;  %v902_v43 = vmax.f32 %v1676_v41, %v784_v42  ;;  %v1681_v45 = vpop.f32.mrb[6].mxu1 }
 0x117   : > { %v1683_v46 = vpop.f32.mrb[7].mxu0  ;;  %v903_v47 = vmax.f32 %v1678_v44, %v1681_v45  ;;  %v1687_v48 = vpop.f32.mrb[7].mxu1  ;;  %v988_v44 = vld [vmem:[%s1939_s3 + $0xd8] sm:$0xff]  ;;  %v993_v45 = vld [vmem:[%s1939_s3 + $0x100] sm:$0xff] }
 0x118   : > { %v904_v49 = vmax.f32 %v1683_v46, %v1687_v48  ;;  %v943_v42 = vpop.permute.xlu1 %942  ;;  %v994_v46 = vld [vmem:[%s1939_s3 + $0x108] sm:$0xff]  ;;  %v995_v48 = vld [vmem:[%s1939_s3 + $0x110] sm:$0xff] }
 0x130   : > { %v825_v51 = vpop.f32.mrb[8].mxu0  ;;  %v878_v52 = vpop.f32.mrb[8].mxu1 }
 0x131   : > { %v827_v53 = vpop.f32.mrb[9].mxu0  ;;  %v905_v54 = vmax.f32 %v825_v51, %v878_v52  ;;  %v880_v55 = vpop.f32.mrb[9].mxu1  ;;  %v985_v52 = vld [vmem:[%s1939_s3 + $0xc0] sm:$0xff] }
 0x132   : > { %v829_v56 = vpop.f32.mrb[10].mxu0  ;;  %v906_v57 = vmax.f32 %v827_v53, %v880_v55  ;;  %v882_v58 = vpop.f32.mrb[10].mxu1 }
 0x133   : > { %v831_v59 = vpop.f32.mrb[11].mxu0  ;;  %v913_v60 = vmax.f32 %v897_v30, %v905_v54  ;;  %v907_v61 = vmax.f32 %v829_v56, %v882_v58  ;;  %v884_v62 = vpop.f32.mrb[11].mxu1  ;;  %v987_v56 = vld [vmem:[%s1939_s3 + $0xd0] sm:$0xff] }
 0x134   : > { %v914_v63 = vmax.f32 %v898_v34, %v906_v57  ;;  %v908_v1 = vmax.f32 %v831_v59, %v884_v62  ;;  %v963_v34 = vld [vmem:[%s1939_s3 + $0x10] sm:$0xff] }
 0x135   : > { %v945_v3 = vadd.f32 %v928_v50, %v913_v60  ;;  %v915_v4 = vmax.f32 %v899_v23, %v907_v61 }
 0x136   : > { %v946_v5 = vadd.f32 %v928_v50, %v914_v63  ;;  %v916_v0 = vmax.f32 %v900_v38, %v908_v1 }
 0x137   : > { %v1697_v9 = vmax.f32 %v945_v3, 0.0  ;;  %v947_v10 = vadd.f32 %v933_v2, %v915_v4  ;;  %v1001_v3 = vld [vmem:[%s1939_s3 + $0x140] sm:$0xff]  ;;  %v1002_v4 = vld [vmem:[%s1939_s3 + $0x148] sm:$0xff] }
 0x138   : > { %v835_v11 = vpop.f32.mrb[12].mxu0  ;;  %v1705_v14 = vmax.f32 %v946_v5, 0.0  ;;  %v948_v15 = vadd.f32 %v933_v2, %v916_v0  ;;  %v888_v16 = vpop.f32.mrb[12].mxu1  ;;  %v1003_v5 = vld [vmem:[%s1939_s3 + $0x150] sm:$0xff] }
 0x139   : > { %v837_v17 = vpop.f32.mrb[13].mxu0  ;;  %v1713_v20 = vmax.f32 %v947_v10, 0.0  ;;  %v909_v21 = vmax.f32 %v835_v11, %v888_v16  ;;  %v890_v22 = vpop.f32.mrb[13].mxu1  ;;  %v1025_v25 = vmul.f32 %v977_v7, %v1697_v9  ;;  %v1009_v26 = vmul.f32 %v961_v8, %v1697_v9  ;;  %v1004_v10 = vld [vmem:[%s1939_s3 + $0x158] sm:$0xff]  ;;  %v971_v11 = vld [vmem:[%s1939_s3 + $0x50] sm:$0xff] }
 0x13a   : > { %v839_v24 = vpop.f32.mrb[14].mxu0  ;;  %v1717_v27 = vmax.f32 %v948_v15, 0.0  ;;  %v910_v28 = vmax.f32 %v837_v17, %v890_v22  ;;  %v892_v29 = vpop.f32.mrb[14].mxu1  ;;  %v1026_v31 = vmul.f32 %v978_v12, %v1705_v14  ;;  %v1010_v33 = vmul.f32 %v962_v13, %v1705_v14  ;;  %v972_v17 = vld [vmem:[%s1939_s3 + $0x58] sm:$0xff] }
 0x13b   : > { %v841_v30 = vpop.f32.mrb[15].mxu0  ;;  %v917_v35 = vmax.f32 %v901_v32, %v909_v21  ;;  %v911_v36 = vmax.f32 %v839_v24, %v892_v29  ;;  %v894_v23 = vpop.f32.mrb[15].mxu1  ;;  %v1017_v37 = vmul.f32 %v969_v18, %v1697_v9  ;;  %v1018_v38 = vmul.f32 %v970_v19, %v1705_v14  ;;  %v986_v32 = vld [vmem:[%s1939_s3 + $0xc8] sm:$0xff]  ;;  %v965_v18 = vld [vmem:[%s1939_s3 + $0x20] sm:$0xff] }
 0x13c   : > { %v918_v40 = vmax.f32 %v902_v43, %v910_v28  ;;  %v912_v41 = vmax.f32 %v841_v30, %v894_v23  ;;  %v1081_v50 = vadd.f32 %v1026_v31, %v1025_v25  ;;  %v1057_v51 = vadd.f32 %v1010_v33, %v1009_v26  ;;  %v966_v19 = vld [vmem:[%s1939_s3 + $0x28] sm:$0xff]  ;;  %v979_v26 = vld [vmem:[%s1939_s3 + $0x90] sm:$0xff]  ;;  %v980_v28 = vld [vmem:[%s1939_s3 + $0x98] sm:$0xff] }
 0x13d   : > { %v949_v53 = vadd.f32 %v938_v6, %v917_v35  ;;  %v919_v54 = vmax.f32 %v903_v47, %v911_v36  ;;  %v1069_v55 = vadd.f32 %v1018_v38, %v1017_v37  ;;  %v1011_v43 = vmul.f32 %v963_v34, %v1713_v20  ;;  %v973_v37 = vld [vmem:[%s1939_s3 + $0x60] sm:$0xff]  ;;  %v974_v38 = vld [vmem:[%s1939_s3 + $0x68] sm:$0xff] }
 0x13e   : > { %v950_v57 = vadd.f32 %v938_v6, %v918_v40  ;;  %v920_v58 = vmax.f32 %v904_v49, %v912_v41  ;;  %1082 = vadd.xlane.f32.xlu1 %v1081_v50  ;;  %1058 = vadd.xlane.f32.xlu0 %v1057_v51  ;;  %v1012_v59 = vmul.f32 %v964_v39, %v1717_v27  ;;  %v996_v49 = vld [vmem:[%s1939_s3 + $0x118] sm:$0xff]  ;;  %v989_v39 = vld [vmem:[%s1939_s3 + $0xe0] sm:$0xff]  ;;  %v990_v51 = vld [vmem:[%s1939_s3 + $0xe8] sm:$0xff] }
 0x13f   : > { %v951_v47 = vadd.f32 %v943_v42, %v919_v54  ;;  %v1033_v60 = vmul.f32 %v985_v52, %v1697_v9  ;;  %v1034_v61 = vmul.f32 %v986_v32, %v1705_v14  ;;  %v1763_v62 = vmax.f32 %v949_v53, 0.0  ;;  %v997_v52 = vld [vmem:[%s1939_s3 + $0x120] sm:$0xff]  ;;  %v998_v32 = vld [vmem:[%s1939_s3 + $0x128] sm:$0xff] }
 0x140   : > { %v1765_v63 = vmax.f32 %v950_v57, 0.0  ;;  %v1060_v1 = vadd.f32 %v1012_v59, %v1011_v43  ;;  %v1035_v2 = vmul.f32 %v987_v56, %v1713_v20  ;;  %v952_v0 = vadd.f32 %v943_v42, %v920_v58  ;;  %v976_v43 = vld [vmem:[%s1939_s3 + $0x78] sm:$0xff] }
 0x141   : > { %v1093_v6 = vadd.f32 %v1034_v61, %v1033_v60  ;;  %v1036_v7 = vmul.f32 %v988_v44, %v1717_v27  ;;  %v1041_v8 = vmul.f32 %v993_v45, %v1697_v9  ;;  %v1785_v12 = vmax.f32 %v951_v47, 0.0  ;;  %v983_v44 = vld [vmem:[%s1939_s3 + $0xb0] sm:$0xff]  ;;  %v984_v45 = vld [vmem:[%s1939_s3 + $0xb8] sm:$0xff] }
 0x142   : > { %1070 = vadd.xlane.f32.xlu0 %v1069_v55  ;;  %1061 = vadd.xlane.f32.xlu1 %v1060_v1  ;;  %v1042_v13 = vmul.f32 %v994_v46, %v1705_v14  ;;  %v1043_v15 = vmul.f32 %v995_v48, %v1713_v20  ;;  %v1044_v16 = vmul.f32 %v996_v49, %v1717_v27  ;;  %v960_v40 = vmax.f32 %v952_v0, 0.0  ;;  %v967_v48 = vld [vmem:[%s1939_s3 + $0x30] sm:$0xff]  ;;  %v968_v49 = vld [vmem:[%s1939_s3 + $0x38] sm:$0xff]  ;;  %v1005_v0 = vld [vmem:[%s1939_s3 + $0x160] sm:$0xff] }
 0x143   : > { %v1096_v21 = vadd.f32 %v1036_v7, %v1035_v2  ;;  %v1049_v22 = vmul.f32 %v1001_v3, %v1697_v9  ;;  %v1050_v24 = vmul.f32 %v1002_v4, %v1705_v14  ;;  %v1051_v25 = vmul.f32 %v1003_v5, %v1713_v20  ;;  %v981_v9 = vld [vmem:[%s1939_s3 + $0xa0] sm:$0xff]  ;;  %v982_v14 = vld [vmem:[%s1939_s3 + $0xa8] sm:$0xff]  ;;  %v991_v1 = vld [vmem:[%s1939_s3 + $0xf0] sm:$0xff] }
 0x144   : > { %v1105_v29 = vadd.f32 %v1042_v13, %v1041_v8  ;;  %v1108_v30 = vadd.f32 %v1044_v16, %v1043_v15  ;;  %v1052_v31 = vmul.f32 %v1004_v10, %v1717_v27  ;;  %v1019_v33 = vmul.f32 %v971_v11, %v1713_v20  ;;  %v992_v5 = vld [vmem:[%s1939_s3 + $0xf8] sm:$0xff]  ;;  %v999_v13 = vld [vmem:[%s1939_s3 + $0x130] sm:$0xff] }
 0x145   : > { %v1117_v34 = vadd.f32 %v1050_v24, %v1049_v22  ;;  %v1020_v35 = vmul.f32 %v972_v17, %v1717_v27  ;;  %v1013_v36 = vmul.f32 %v965_v18, %v1763_v62  ;;  %v1014_v23 = vmul.f32 %v966_v19, %v1765_v63  ;;  %v1000_v15 = vld [vmem:[%s1939_s3 + $0x138] sm:$0xff] }
 0x146   : > { %1094 = vadd.xlane.f32.xlu0 %v1093_v6  ;;  %1097 = vadd.xlane.f32.xlu1 %v1096_v21  ;;  %v1120_v41 = vadd.f32 %v1052_v31, %v1051_v25  ;;  %v1027_v42 = vmul.f32 %v979_v26, %v1713_v20  ;;  %v1028_v50 = vmul.f32 %v980_v28, %v1717_v27  ;;  %v975_v27 = vld [vmem:[%s1939_s3 + $0x70] sm:$0xff]  ;;  %v1006_v6 = vld [vmem:[%s1939_s3 + $0x168] sm:$0xff]  ;;  %v1008_v22 = vld [vmem:[%s1939_s3 + $0x178] sm:$0xff] }
 0x147   : > { %v1072_v53 = vadd.f32 %v1020_v35, %v1019_v33  ;;  %v1063_v54 = vadd.f32 %v1014_v23, %v1013_v36  ;;  %v1029_v55 = vmul.f32 %v981_v9, %v1763_v62  ;;  %v1030_v20 = vmul.f32 %v982_v14, %v1765_v63  ;;  %v1007_v21 = vld [vmem:[%s1939_s3 + $0x170] sm:$0xff] }
 0x148   : > { %v1084_v56 = vadd.f32 %v1028_v50, %v1027_v42  ;;  %v1021_v57 = vmul.f32 %v973_v37, %v1763_v62  ;;  %v1022_v58 = vmul.f32 %v974_v38, %v1765_v63  ;;  %v1037_v59 = vmul.f32 %v989_v39, %v1763_v62 }
 0x149   : > { %v1087_v47 = vadd.f32 %v1030_v20, %v1029_v55  ;;  %v1038_v60 = vmul.f32 %v990_v51, %v1765_v63  ;;  %v1045_v61 = vmul.f32 %v997_v52, %v1763_v62  ;;  %v1046_v46 = vmul.f32 %v998_v32, %v1765_v63 }
 0x14a   : > { %1106 = vadd.xlane.f32.xlu0 %v1105_v29  ;;  %1109 = vadd.xlane.f32.xlu1 %v1108_v30  ;;  %v1075_v2 = vadd.f32 %v1022_v58, %v1021_v57  ;;  %v1023_v3 = vmul.f32 %v975_v27, %v1785_v12  ;;  %v1024_v4 = vmul.f32 %v976_v43, %v960_v40  ;;  %v1153_v52 = vlaneseq }
 0x14b   : > { %v1099_v7 = vadd.f32 %v1038_v60, %v1037_v59  ;;  %v1111_v8 = vadd.f32 %v1046_v46, %v1045_v61  ;;  %v1031_v10 = vmul.f32 %v983_v44, %v1785_v12  ;;  %v1032_v11 = vmul.f32 %v984_v45, %v960_v40 }
 0x14c   : > { %v1078_v16 = vadd.f32 %v1024_v4, %v1023_v3  ;;  %v1015_v17 = vmul.f32 %v967_v48, %v1785_v12  ;;  %v1016_v18 = vmul.f32 %v968_v49, %v960_v40  ;;  %v1039_v19 = vmul.f32 %v991_v1, %v1785_v12 }
 0x14d   : > { %v1090_v24 = vadd.f32 %v1032_v11, %v1031_v10  ;;  %v1040_v25 = vmul.f32 %v992_v5, %v960_v40  ;;  %v1053_v26 = vmul.f32 %v1005_v0, %v1763_v62  ;;  %v1054_v28 = vmul.f32 %v1006_v6, %v1765_v63 }
 0x14e   : > { %1118 = vadd.xlane.f32.xlu0 %v1117_v34  ;;  %1121 = vadd.xlane.f32.xlu1 %v1120_v41  ;;  %v1066_v29 = vadd.f32 %v1016_v18, %v1015_v17  ;;  %v1047_v30 = vmul.f32 %v999_v13, %v1785_v12  ;;  %v1048_v31 = vmul.f32 %v1000_v15, %v960_v40  ;;  %v1156_v43 = vshrl.u32 %v1153_v52, 7 }
 0x14f   : > { %v1102_v33 = vadd.f32 %v1040_v25, %v1039_v19  ;;  %v1123_v9 = vadd.f32 %v1054_v28, %v1053_v26  ;;  %v1055_v14 = vmul.f32 %v1007_v21, %v1785_v12  ;;  %v1056_v35 = vmul.f32 %v1008_v22, %v960_v40 }
 0x150   : > { %v1114_v36 = vadd.f32 %v1048_v31, %v1047_v30 }
 0x151   : > { %v1126_v23 = vadd.f32 %v1056_v35, %v1055_v14 }
 0x152   : > { %1073 = vadd.xlane.f32.xlu0 %v1072_v53  ;;  %1064 = vadd.xlane.f32.xlu1 %v1063_v54  ;;  %v1154_v54 = vand.u32 127, %v1153_v52 }
 0x154   : > { %v1159_v27 = vadd.s32 4294967288, %v1154_v54  ;;  %v1173_v44 = vadd.s32 4294967272, %v1154_v54  ;;  %v1157_v45 = vsub.s32 %v1154_v54, %v1156_v43 }
 0x156   : > { %1085 = vadd.xlane.f32.xlu0 %v1084_v56  ;;  %1088 = vadd.xlane.f32.xlu1 %v1087_v47  ;;  %v1166_v56 = vadd.s32 4294967280, %v1154_v54  ;;  %v1162_v59 = vsub.s32 %v1159_v27, %v1156_v43  ;;  %v1176_v48 = vsub.s32 %v1173_v44, %v1156_v43  ;;  %v1290_v27 = vld [vmem:[%s1940_s4] sm:$0x3f] }
 0x158   : > { %v1169_v47 = vsub.s32 %v1166_v56, %v1156_v43 }
 0x15a   : > { %1076 = vadd.xlane.f32.xlu0 %v1075_v2  ;;  %1100 = vadd.xlane.f32.xlu1 %v1099_v7 }
 0x15e   : > { %1112 = vadd.xlane.f32.xlu1 %v1111_v8  ;;  %1079 = vadd.xlane.f32.xlu0 %v1078_v16 }
 0x162   : > { %1091 = vadd.xlane.f32.xlu0 %v1090_v24  ;;  %1067 = vadd.xlane.f32.xlu1 %v1066_v29 }
 0x166   : > { %1103 = vadd.xlane.f32.xlu0 %v1102_v33  ;;  %1124 = vadd.xlane.f32.xlu1 %v1123_v9 }
 0x16a   : > { %1115 = vadd.xlane.f32.xlu0 %v1114_v36 }
 0x16e   : > { %1127 = vadd.xlane.f32.xlu0 %v1126_v23 }
 0x1cb   : > { %v1083_v62 = vpop.xlane.xlu1 %1082  ;;  %v1059_v63 = vpop.xlane.xlu0 %1058 }
 0x1cc   : > { %v1202_v49 = vrot.slane %v1083_v62, %v1157_v45  ;;  %v1158_v3 = vrot.slane %v1059_v63, %v1157_v45 }
 0x1cf   : > { %v1071_v12 = vpop.xlane.xlu0 %1070  ;;  %v1062_v34 = vpop.xlane.xlu1 %1061 }
 0x1d0   : > { %v1163_v46 = vrot.slane %v1062_v34, %v1162_v59  ;;  %v1183_v13 = vrot.slane %v1071_v12, %v1157_v45 }
 0x1d2   : > { %v1165_v15 = vsel %vm1164_vm1, %v1163_v46, %v1158_v3 }
 0x1d3   : > { %v1095_v37 = vpop.xlane.xlu0 %1094  ;;  %v1098_v38 = vpop.xlane.xlu1 %1097 }
 0x1d4   : > { %v1221_v4 = vrot.slane %v1095_v37, %v1157_v45  ;;  %v1225_v6 = vrot.slane %v1098_v38, %v1162_v59 }
 0x1d6   : > { %v1226_v30 = vsel %vm1164_vm1, %v1225_v6, %v1221_v4 }
 0x1d7   : > { %v1107_v39 = vpop.xlane.xlu0 %1106  ;;  %v1110_v40 = vpop.xlane.xlu1 %1109 }
 0x1d8   : > { %v1240_v7 = vrot.slane %v1107_v39, %v1157_v45  ;;  %v1244_v8 = vrot.slane %v1110_v40, %v1162_v59 }
 0x1da   : > { %v1245_v31 = vsel %vm1164_vm1, %v1244_v8, %v1240_v7 }
 0x1db   : > { %v1897_v41 = vpop.xlane.xlu0 %1118  ;;  %v1899_v42 = vpop.xlane.xlu1 %1121 }
 0x1dc   : > { %v1259_v33 = vrot.slane %v1897_v41, %v1157_v45  ;;  %v1263_v35 = vrot.slane %v1899_v42, %v1162_v59 }
 0x1de   : > { %v1264_v42 = vsel %vm1164_vm1, %v1263_v35, %v1259_v33 }
 0x1df   : > { %v1074_v50 = vpop.xlane.xlu0 %1073  ;;  %v1065_v51 = vpop.xlane.xlu1 %1064 }
 0x1e0   : > { %v1170_v1 = vrot.slane %v1065_v51, %v1169_v47  ;;  %v1187_v5 = vrot.slane %v1074_v50, %v1162_v59 }
 0x1e2   : > { %v1172_v18 = vsel %vm1171_vm2, %v1170_v1, %v1165_v15  ;;  %v1188_v24 = vsel %vm1164_vm1, %v1187_v5, %v1183_v13 }
 0x1e3   : > { %v1086_v32 = vpop.xlane.xlu0 %1085  ;;  %v1089_v53 = vpop.xlane.xlu1 %1088 }
 0x1e4   : > { %v1206_v2 = vrot.slane %v1086_v32, %v1162_v59  ;;  %v1211_v16 = vrot.slane %v1089_v53, %v1169_v47 }
 0x1e6   : > { %v1207_v19 = vsel %vm1164_vm1, %v1206_v2, %v1202_v49 }
 0x1e7   : > { %v1077_v55 = vpop.xlane.xlu0 %1076  ;;  %v1101_v20 = vpop.xlane.xlu1 %1100  ;;  %v1212_v36 = vsel %vm1171_vm2, %v1211_v16, %v1207_v19 }
 0x1e8   : > { %v1192_v10 = vrot.slane %v1077_v55, %v1169_v47  ;;  %v1230_v21 = vrot.slane %v1101_v20, %v1169_v47 }
 0x1ea   : > { %v1193_v9 = vsel %vm1171_vm2, %v1192_v10, %v1188_v24  ;;  %v1231_v63 = vsel %vm1171_vm2, %v1230_v21, %v1226_v30 }
 0x1eb   : > { %v1113_v57 = vpop.xlane.xlu1 %1112  ;;  %v1080_v58 = vpop.xlane.xlu0 %1079 }
 0x1ec   : > { %v1197_v17 = vrot.slane %v1080_v58, %v1176_v48  ;;  %v1249_v25 = vrot.slane %v1113_v57, %v1169_v47 }
 0x1ee   : > { %v1198_v23 = vsel %vm1178_vm3, %v1197_v17, %v1193_v9  ;;  %v1250_v38 = vsel %vm1171_vm2, %v1249_v25, %v1245_v31 }
 0x1ef   : > { %v1092_v60 = vpop.xlane.xlu0 %1091  ;;  %v1068_v61 = vpop.xlane.xlu1 %1067 }
 0x1f0   : > { %v1177_v0 = vrot.slane %v1068_v61, %v1176_v48  ;;  %v1216_v22 = vrot.slane %v1092_v60, %v1176_v48 }
 0x1f2   : > { %v1179_v26 = vsel %vm1178_vm3, %v1177_v0, %v1172_v18  ;;  %v1217_v12 = vsel %vm1178_vm3, %v1216_v22, %v1212_v36 }
 0x1f3   : > { %v1104_v11 = vpop.xlane.xlu0 %1103  ;;  %v1125_v29 = vpop.xlane.xlu1 %1124  ;;  %v1276_v34 = vsel %vm1275_vm4, %v1198_v23, %v1179_v26 }
 0x1f4   : > { %v1235_v28 = vrot.slane %v1104_v11, %v1176_v48  ;;  %v1268_v37 = vrot.slane %v1125_v29, %v1169_v47  ;;  %v1278_v51 = vsel %vm1277_vm5, %v1217_v12, %v1276_v34 }
 0x1f6   : > { %v1236_v39 = vsel %vm1178_vm3, %v1235_v28, %v1231_v63  ;;  %v1269_v52 = vsel %vm1171_vm2, %v1268_v37, %v1264_v42 }
 0x1f7   : > { %v1116_v14 = vpop.xlane.xlu0 %1115  ;;  %v1280_v32 = vsel %vm1279_vm6, %v1236_v39, %v1278_v51 }
 0x1f8   : > { %v1254_v62 = vrot.slane %v1116_v14, %v1176_v48 }
 0x1fa   : > { %v1255_v40 = vsel %vm1178_vm3, %v1254_v62, %v1250_v38 }
 0x1fb   : > { %v1128_v41 = vpop.xlane.xlu0 %1127  ;;  %v1282_v54 = vsel %vm1281_vm7, %v1255_v40, %v1280_v32 }
 0x1fc   : > { %v1273_v50 = vrot.slane %v1128_v41, %v1176_v48 }
 0x1fe   : > { %v1274_v53 = vsel %vm1178_vm3, %v1273_v50, %v1269_v52 }
 0x1ff   : > { %v1284_v55 = vsel %vm1283_vm8, %v1274_v53, %v1282_v54 }
 0x200   : > { %v1287_v20 = vsel %vm1286_vm9, %v1284_v55, 0.0 }
 0x201   : > { %1288 = vadd.xlane.f32.xlu1 %v1287_v20 }
 0x28e   : > { %v1289_v43 = vpop.xlane.xlu1 %1288 }
 0x28f   : > { %v1291_v56 = vadd.f32 %v1290_v27, %v1289_v43 }
 0x291   : > { %v1293_v57 = vsel %vm1292_vm10, %v1291_v56, -inf }
 0x292   : > { %1294 = vmax.xlane.f32.xlu0 %v1293_v57 }
 0x31f   : > { %v1295_v58 = vpop.xlane.xlu0 %1294 }
 0x320   : > { %v1296_v59 = vrot.slane %v1295_v58, 4 }
 0x322   : > { %v1297_v44 = vmax.f32 %v1295_v58, %v1296_v59 }
 0x324   : > { %v1298_v45 = vrot.slane %v1297_v44, 2 }
 0x326   : > { %v1299_v47 = vmax.f32 %v1297_v44, %v1298_v45 }
 0x328   : > { %v1300_v60 = vrot.slane %v1299_v47, 1 }
 0x32a   : > { %v1301_v61 = vmax.f32 %v1299_v47, %v1300_v60 }
 0x32c   : > { %1468 = vpush %v1301_v61 }
 0x35d   : > { %s1469_s23 = spop %1468 }
 0x35e   : > { %v1303_v46 = vstv %s1469_s23 }
 0x35f   : > { %v1304_v48 = vsub.f32 %v1291_v56, %v1303_v46 }
 0x361   : > { %v1305_v49 = vmul.f32 1.442695, %v1304_v48 }
 0x363   : > { %1489 = vpow2.f32 %v1305_v49 }
 0x36d   : > { %v1490_v1 = vpop.eup %1489 }
 0x36e   : > { %v1307_v2 = vsel %vm1292_vm10, %v1490_v1, 0.0 }
 0x36f   : > { %1308 = vadd.xlane.f32.xlu1 %v1307_v2 }
 0x3fc   : > { %v1309_v3 = vpop.xlane.xlu1 %1308 }
 0x3fd   : > { %v1310_v4 = vrot.slane %v1309_v3, 4 }
 0x3ff   : > { %v1311_v5 = vadd.f32 %v1310_v4, %v1309_v3 }
 0x401   : > { %v1312_v0 = vrot.slane %v1311_v5, 2 }
 0x403   : > { %v1313_v6 = vadd.f32 %v1312_v0, %v1311_v5 }
 0x405   : > { %v1314_v7 = vrot.slane %v1313_v6, 1 }
 0x407   : > { %v1315_v8 = vadd.f32 %v1314_v7, %v1313_v6 }
 0x409   : > { %1470 = vpush %v1315_v8 }
 0x43a   : > { %s1471_s24 = spop %1470 }
 0x43b   : > { %v1317_v10 = vstv %s1471_s24 }
 0x43c   : > { %1491 = vrcp.f32 %v1317_v10 }
 0x446   : > { %v1492_v11 = vpop.eup %1491 }
 0x447   : > { %v1319_v13 = vmul.f32 %v1492_v11, %v1490_v1 }
 0x449   : > { %1320 = vst.msk [vmem:[%s222_s28] sm:$0x3f] %vm1292_vm10, %v1319_v13 }
 0x44a PF: > { %s15_s18 = sadd.s32 1, %s1499_s18  }
 0x44b   : > { %p12_p4 = scmp.ge.s32.totalorder %s15_s18, 4  }
 0x44d   :  { %14 = sbr.rel (!%p12_p4) target bundleno = 1 (0x1), region = 70 }

</bundles_post_ra>
